<compile_context>
chip_gen: v7x
topology: tpu7x:2x2x1
jax: 0.10.0
libtpu: 0.0.40
codegen_flags: <defaults>
</compile_context>

<pallas_src>
import functools

import jax
import jax.numpy as jnp
from jax.experimental import pallas as pl
from jax.experimental.pallas import tpu as pltpu


_VMEM_LIMIT_BYTES = 48 * 1024 * 1024    # explicit scoped-VMEM limit (< 64 MiB v7x physical)
_VMEM_TILE_BUDGET = 32 * 1024 * 1024    # conservative per-call working-set target


def _round_up(x, m):
    return ((x + m - 1) // m) * m


def _pick_tile_m(m, kpad, cpad, out_bytes):
    """Largest tile_m in {1024,512,256,128} with grid_m >= 2 and a double-buffered
    working set under the (v7x-safe) budget; for tiny M, split in half so both
    v7x TensorCores get a tile."""
    for cand in (1024, 512, 256, 128):
        grid_m = _round_up(m, cand) // cand
        if grid_m < 2:
            continue
        vmem = (2 * cand * kpad * 2            # streamed bf16 cols tile, double-buffered
                + 2 * kpad * cpad * 2          # resident bf16 weights (worst case 2 bufs)
                + 2 * cand * cpad * out_bytes  # output tile, double-buffered
                + 2 * 8 * cpad * 4             # stats tile
                + 2 * cpad * 4)                # bias
        if vmem <= _VMEM_TILE_BUDGET:
            return cand
    # M too small for two 128-row tiles: two tiles of ceil(M/2) rounded to sublane.
    return max(8, _round_up(-(-m // 2), 8))


# ----------------------------- Pallas kernels ------------------------------ #

def _conv_mm_kernel(x_ref, w_ref, b_ref, o_ref, *, sigmoid: bool):
    """cols-tile (bf16) @ W (bf16) -> f32 acc, + bias, optional sigmoid, cast out."""
    acc = jnp.dot(x_ref[...], w_ref[...], preferred_element_type=jnp.float32)
    acc = acc + b_ref[...]                       # f32 bias, broadcast over rows
    if sigmoid:
        acc = 1.0 / (1.0 + jnp.exp(-acc))        # exp on EUP; exact divide keeps [0,1]
    o_ref[...] = acc.astype(o_ref.dtype)


def _conv_mm_stats_kernel(x_ref, w_ref, b_ref, o_ref, stats_ref):
    """Same as above (no sigmoid) + a single sublane-aligned (8, Cpad) stats block:
    row 0 = sum(acc - bias), row 1 = sum((acc - bias)^2) over the tile's rows.
    Bias-centering makes zero-padded cols rows contribute exactly 0."""
    acc = jnp.dot(x_ref[...], w_ref[...], preferred_element_type=jnp.float32)
    bias = b_ref[...]
    acc = acc + bias
    o_ref[...] = acc.astype(o_ref.dtype)
    centered = acc - bias
    s0 = jnp.sum(centered, axis=0, keepdims=True)            # (1, Cpad)
    s1 = jnp.sum(centered * centered, axis=0, keepdims=True)  # (1, Cpad)
    row = jax.lax.broadcasted_iota(jnp.int32, stats_ref.shape, 0)
    stats_ref[...] = jnp.where(row == 0, s0, jnp.where(row == 1, s1, 0.0))


# ------------------------------ glue (JAX) --------------------------------- #

def _leaky(x):
    return jnp.where(x >= 0, x, 0.2 * x)


def _im2col(x, kh, kw, stride, pad):
    """x: [N, H, W, C] -> patches [N*OH*OW, kh*kw*C] (kh-major, kw, c-minor).
    Dtype-preserving (fed bf16 so the dominant HBM stream is 2 B/elem)."""
    n, h, w, c = x.shape
    xp = jnp.pad(x, ((0, 0), (pad, pad), (pad, pad), (0, 0)))
    oh = (h + 2 * pad - kh) // stride + 1
    ow = (w + 2 * pad - kw) // stride + 1
    pieces = []
    for i in range(kh):
        for j in range(kw):
            pieces.append(xp[:, i:i + stride * oh:stride, j:j + stride * ow:stride, :])
    cols = jnp.stack(pieces, axis=3)              # [N, OH, OW, kh*kw, C]
    return cols.reshape(n * oh * ow, kh * kw * c), oh, ow


def _conv2d_pallas(a, w, b, *, stride=2, pad=2, sigmoid=False, want_stats=False,
                   out_dtype=jnp.bfloat16):
    """a: [N,H,W,Cin], w: [KH,KW,Cin,Cout] f32, b: [Cout] f32.
    Returns y [N,OH,OW,Cout] (out_dtype) and optionally (mean, var) per channel."""
    assert not (want_stats and sigmoid), "stats only valid on pre-sigmoid layers"
    n = a.shape[0]
    kh, kw, cin, cout = w.shape
    cols, oh, ow = _im2col(a.astype(jnp.bfloat16), kh, kw, stride, pad)  # [M, K] bf16
    m, k = cols.shape

    kpad = _round_up(k, 128)
    cpad = _round_up(cout, 128)
    out_bytes = jnp.dtype(out_dtype).itemsize
    tile_m = _pick_tile_m(m, kpad, cpad, out_bytes)
    mpad = _round_up(m, tile_m)
    grid_m = mpad // tile_m

    # Zero-padded, lane-dense / tile-aligned operands (cols already bf16).
    cols_p = jnp.pad(cols, ((0, mpad - m), (0, kpad - k)))
    wmat = jnp.pad(w.reshape(kh * kw * cin, cout).astype(jnp.bfloat16),
                   ((0, kpad - k), (0, cpad - cout)))
    bias_f32 = b.astype(jnp.float32)
    bmat = jnp.pad(bias_f32.reshape(1, cout), ((0, 0), (0, cpad - cout)))

    in_specs = [
        pl.BlockSpec((tile_m, kpad), lambda i: (i, 0)),   # streamed cols tiles
        pl.BlockSpec((kpad, cpad), lambda i: (0, 0)),     # resident weights
        pl.BlockSpec((1, cpad), lambda i: (0, 0)),        # resident bias
    ]
    cparams = pltpu.CompilerParams(
        dimension_semantics=("parallel",),                # megacore-shard M on v7x
        vmem_limit_bytes=_VMEM_LIMIT_BYTES,
    )

    if want_stats:
        out, stats = pl.pallas_call(
            _conv_mm_stats_kernel,
            out_shape=(jax.ShapeDtypeStruct((mpad, cpad), out_dtype),
                       jax.ShapeDtypeStruct((grid_m * 8, cpad), jnp.float32)),
            grid=(grid_m,),
            in_specs=in_specs,
            out_specs=(pl.BlockSpec((tile_m, cpad), lambda i: (i, 0)),
                       pl.BlockSpec((8, cpad), lambda i: (i, 0))),
            compiler_params=cparams,
        )(cols_p, wmat, bmat)
        y = out[:m, :cout].reshape(n, oh, ow, cout)
        stats = stats.reshape(grid_m, 8, cpad)
        count = float(m)                                   # real rows = N*OH*OW
        mean_c = jnp.sum(stats[:, 0, :cout], axis=0) / count
        ex2_c = jnp.sum(stats[:, 1, :cout], axis=0) / count
        mean = bias_f32 + mean_c                           # un-center
        var = jnp.maximum(ex2_c - mean_c * mean_c, 0.0)    # biased batch variance
        return y, mean, var

    out = pl.pallas_call(
        functools.partial(_conv_mm_kernel, sigmoid=sigmoid),
        out_shape=jax.ShapeDtypeStruct((mpad, cpad), out_dtype),
        grid=(grid_m,),
        in_specs=in_specs,
        out_specs=pl.BlockSpec((tile_m, cpad), lambda i: (i, 0)),
        compiler_params=cparams,
    )(cols_p, wmat, bmat)
    return out[:m, :cout].reshape(n, oh, ow, cout)


def _bn_leaky(h, mean, var, gamma, beta, eps=1e-5):
    """Training-mode BatchNorm (batch stats, biased var) + leaky_relu(0.2) as a
    per-channel f32 affine on the bf16 activation; XLA fuses this into the next
    conv's im2col construction. Returns bf16 for the next layer's cols stream."""
    scale = gamma * jax.lax.rsqrt(var + eps)
    shift = beta - mean * scale
    y = h.astype(jnp.float32) * scale + shift
    return jnp.where(y >= 0, y, 0.2 * y).astype(jnp.bfloat16)


# ------------------------------- TurbNetD ---------------------------------- #

def init_params(key, in_channels1, in_channels2, ch):
    conv_dims = [
        (in_channels1 + in_channels2, ch),
        (ch, ch * 2),
        (ch * 2, ch * 4),
        (ch * 4, ch * 8),
        (ch * 8, 1),
    ]
    params = {}
    for i, (cin, cout) in enumerate(conv_dims):
        key, k1, k2 = jax.random.split(key, 3)
        scale = 1.0 / jnp.sqrt(float(cin * 4 * 4))
        params[f"w{i}"] = jax.random.normal(k1, (4, 4, cin, cout), jnp.float32) * scale
        params[f"b{i}"] = jax.random.normal(k2, (cout,), jnp.float32) * scale
    for i, c in zip((1, 2, 3), (ch * 2, ch * 4, ch * 8)):
        key, k1, k2 = jax.random.split(key, 3)
        params[f"g{i}"] = 1.0 + 0.1 * jax.random.normal(k1, (c,), jnp.float32)
        params[f"beta{i}"] = 0.1 * jax.random.normal(k2, (c,), jnp.float32)
    return params


def turbnet_d_forward(params, x1_nchw, x2_nchw):
    """Mirrors TurbNetD.forward. Inputs/outputs are NCHW like the PyTorch module."""
    x1 = jnp.transpose(x1_nchw, (0, 2, 3, 1))
    x2 = jnp.transpose(x2_nchw, (0, 2, 3, 1))
    x = jnp.concatenate([x1, x2], axis=-1).astype(jnp.bfloat16)      # torch.cat(dim=1)

    h0 = _conv2d_pallas(x, params["w0"], params["b0"])               # c0
    a = _leaky(h0)                                                   # leaky before c1
    h1, m1, v1 = _conv2d_pallas(a, params["w1"], params["b1"], want_stats=True)  # c1
    a = _bn_leaky(h1, m1, v1, params["g1"], params["beta1"])         # bnc1 + leaky
    h2, m2, v2 = _conv2d_pallas(a, params["w2"], params["b2"], want_stats=True)  # c2
    a = _bn_leaky(h2, m2, v2, params["g2"], params["beta2"])         # bnc2 + leaky
    h3, m3, v3 = _conv2d_pallas(a, params["w3"], params["b3"], want_stats=True)  # c3
    a = _bn_leaky(h3, m3, v3, params["g3"], params["beta3"])         # bnc3 + leaky
    h4 = _conv2d_pallas(a, params["w4"], params["b4"], sigmoid=True,
                        out_dtype=jnp.float32)                       # c4 + sigmoid

    return jnp.transpose(h4, (0, 3, 1, 2))                           # back to NCHW


if __name__ == "__main__":
    key = jax.random.PRNGKey(0)
    kp, kx1, kx2 = jax.random.split(key, 3)

    in_channels1, in_channels2, ch = 2, 2, 8
    params = init_params(kp, in_channels1, in_channels2, ch)

    x1 = jax.random.normal(kx1, (2, in_channels1, 16, 16), jnp.float32)
    x2 = jax.random.normal(kx2, (2, in_channels2, 16, 16), jnp.float32)

    fwd = jax.jit(turbnet_d_forward)
    out = fwd(params, x1, x2)
    jax.block_until_ready(out)

    # 16 -> 9 -> 5 -> 3 -> 2 -> 2 spatial, 1 output channel, sigmoid-bounded.
    assert out.shape == (2, 1, 2, 2), out.shape
    assert bool(jnp.all((out >= 0.0) & (out <= 1.0)))
    print("KERNEL_OK")
</pallas_src>

<mosaic_0001>
module attributes {stable_mosaic.version = 11 : i64} {
  func.func @_conv_mm_kernel(%arg0: i32, %arg1: memref<128x128xbf16, #tpu.memory_space<vmem>>, %arg2: memref<128x128xbf16, #tpu.memory_space<vmem>>, %arg3: memref<1x128xf32, #tpu.memory_space<vmem>>, %arg4: memref<128x128xbf16, #tpu.memory_space<vmem>>) attributes {dimension_semantics = [#tpu.dimension_semantics<parallel>], iteration_bounds = array<i64: 2>, scalar_prefetch = 0 : i64, scratch_operands = 0 : i64, tpu.core_type = #tpu.core_type<tc>, window_params = [{transform_indices = @transform_0, window_bounds = array<i64: 128, 128>}, {pipeline_mode = #tpu.pipeline_mode<synchronous>, transform_indices = @transform_1, window_bounds = array<i64: 128, 128>}, {pipeline_mode = #tpu.pipeline_mode<synchronous>, transform_indices = @transform_2, window_bounds = array<i64: 1, 128>}, {transform_indices = @transform_3, window_bounds = array<i64: 128, 128>}]} {
    %c0 = arith.constant 0 : index
    %c0_0 = arith.constant 0 : index
    %0 = vector.load %arg1[%c0, %c0_0] : memref<128x128xbf16, #tpu.memory_space<vmem>>, vector<128x128xbf16>
    %c0_1 = arith.constant 0 : index
    %c0_2 = arith.constant 0 : index
    %1 = vector.load %arg2[%c0_1, %c0_2] : memref<128x128xbf16, #tpu.memory_space<vmem>>, vector<128x128xbf16>
    %cst = arith.constant dense<0.000000e+00> : vector<128x128xf32>
    %2 = tpu.matmul %0, %1, %cst {dimension_numbers = #tpu.dot_dimension_numbers<[1], [0], [0], [1], [0, 0, 1, 1], [], []>} : vector<128x128xbf16>, vector<128x128xbf16>, vector<128x128xf32> -> vector<128x128xf32>
    %c0_3 = arith.constant 0 : index
    %c0_4 = arith.constant 0 : index
    %3 = vector.load %arg3[%c0_3, %c0_4] : memref<1x128xf32, #tpu.memory_space<vmem>>, vector<1x128xf32>
    %4 = vector.broadcast %3 : vector<1x128xf32> to vector<128x128xf32>
    %5 = arith.addf %2, %4 : vector<128x128xf32>
    %6 = arith.truncf %5 : vector<128x128xf32> to vector<128x128xbf16>
    %c0_5 = arith.constant 0 : index
    %c0_6 = arith.constant 0 : index
    %7 = vector.load %arg4[%c0_5, %c0_6] : memref<128x128xbf16, #tpu.memory_space<vmem>>, vector<128x128xbf16>
    tpu.vector_store %arg4[%c0_5, %c0_6], %6 {strides = array<i32>} : memref<128x128xbf16, #tpu.memory_space<vmem>>, vector<128x128xbf16>,
    return
  }
  func.func @transform_0(%arg0: i32) -> (i32, i32) {
    %c0_i32 = arith.constant 0 : i32
    %c0_i32_0 = arith.constant 0 : i32
    return %arg0, %c0_i32 : i32, i32
  }
  func.func @transform_1(%arg0: i32) -> (i32, i32) {
    %c0_i32 = arith.constant 0 : i32
    %c0_i32_0 = arith.constant 0 : i32
    %c0_i32_1 = arith.constant 0 : i32
    return %c0_i32, %c0_i32_0 : i32, i32
  }
  func.func @transform_2(%arg0: i32) -> (i32, i32) {
    %c0_i32 = arith.constant 0 : i32
    %c0_i32_0 = arith.constant 0 : i32
    %c0_i32_1 = arith.constant 0 : i32
    return %c0_i32, %c0_i32_0 : i32, i32
  }
  func.func @transform_3(%arg0: i32) -> (i32, i32) {
    %c0_i32 = arith.constant 0 : i32
    %c0_i32_0 = arith.constant 0 : i32
    return %arg0, %c0_i32 : i32, i32
  }
}

module attributes {stable_mosaic.version = 11 : i64} {
  func.func @_conv_mm_stats_kernel(%arg0: i32, %arg1: memref<32x128xbf16, #tpu.memory_space<vmem>>, %arg2: memref<128x128xbf16, #tpu.memory_space<vmem>>, %arg3: memref<1x128xf32, #tpu.memory_space<vmem>>, %arg4: memref<32x128xbf16, #tpu.memory_space<vmem>>, %arg5: memref<8x128xf32, #tpu.memory_space<vmem>>) attributes {dimension_semantics = [#tpu.dimension_semantics<parallel>], iteration_bounds = array<i64: 2>, scalar_prefetch = 0 : i64, scratch_operands = 0 : i64, tpu.core_type = #tpu.core_type<tc>, window_params = [{transform_indices = @transform_0, window_bounds = array<i64: 32, 128>}, {pipeline_mode = #tpu.pipeline_mode<synchronous>, transform_indices = @transform_1, window_bounds = array<i64: 128, 128>}, {pipeline_mode = #tpu.pipeline_mode<synchronous>, transform_indices = @transform_2, window_bounds = array<i64: 1, 128>}, {transform_indices = @transform_3, window_bounds = array<i64: 32, 128>}, {transform_indices = @transform_4, window_bounds = array<i64: 8, 128>}]} {
    %c0 = arith.constant 0 : index
    %c0_0 = arith.constant 0 : index
    %0 = vector.load %arg1[%c0, %c0_0] : memref<32x128xbf16, #tpu.memory_space<vmem>>, vector<32x128xbf16>
    %c0_1 = arith.constant 0 : index
    %c0_2 = arith.constant 0 : index
    %1 = vector.load %arg2[%c0_1, %c0_2] : memref<128x128xbf16, #tpu.memory_space<vmem>>, vector<128x128xbf16>
    %cst = arith.constant dense<0.000000e+00> : vector<32x128xf32>
    %2 = tpu.matmul %0, %1, %cst {dimension_numbers = #tpu.dot_dimension_numbers<[1], [0], [0], [1], [0, 0, 1, 1], [], []>} : vector<32x128xbf16>, vector<128x128xbf16>, vector<32x128xf32> -> vector<32x128xf32>
    %c0_3 = arith.constant 0 : index
    %c0_4 = arith.constant 0 : index
    %3 = vector.load %arg3[%c0_3, %c0_4] : memref<1x128xf32, #tpu.memory_space<vmem>>, vector<1x128xf32>
    %4 = vector.broadcast %3 : vector<1x128xf32> to vector<32x128xf32>
    %5 = arith.addf %2, %4 : vector<32x128xf32>
    %6 = arith.truncf %5 : vector<32x128xf32> to vector<32x128xbf16>
    %c0_5 = arith.constant 0 : index
    %c0_6 = arith.constant 0 : index
    %7 = vector.load %arg4[%c0_5, %c0_6] : memref<32x128xbf16, #tpu.memory_space<vmem>>, vector<32x128xbf16>
    tpu.vector_store %arg4[%c0_5, %c0_6], %6 {strides = array<i32>} : memref<32x128xbf16, #tpu.memory_space<vmem>>, vector<32x128xbf16>,
    %8 = vector.broadcast %3 : vector<1x128xf32> to vector<32x128xf32>
    %9 = arith.subf %5, %8 : vector<32x128xf32>
    %cst_7 = arith.constant dense<0.000000e+00> : vector<128xf32>
    %10 = vector.multi_reduction <add>, %9, %cst_7 [0] : vector<32x128xf32> to vector<128xf32>
    %11 = vector.shape_cast %10 : vector<128xf32> to vector<1x128xf32>
    %12 = arith.mulf %9, %9 : vector<32x128xf32>
    %cst_8 = arith.constant dense<0.000000e+00> : vector<128xf32>
    %13 = vector.multi_reduction <add>, %12, %cst_8 [0] : vector<32x128xf32> to vector<128xf32>
    %14 = vector.shape_cast %13 : vector<128xf32> to vector<1x128xf32>
    %15 = tpu.iota {dimensions = array<i32: 0>} : vector<8x128xi32>
    %c0_i32 = arith.constant 0 : i32
    %16 = vector.broadcast %c0_i32 : i32 to vector<8x128xi32>
    %17 = arith.cmpi eq, %15, %16 : vector<8x128xi32>
    %c1_i32 = arith.constant 1 : i32
    %18 = vector.broadcast %c1_i32 : i32 to vector<8x128xi32>
    %19 = arith.cmpi eq, %15, %18 : vector<8x128xi32>
    %cst_9 = arith.constant 0.000000e+00 : f32
    %20 = vector.shape_cast %14 : vector<1x128xf32> to vector<1x128xf32>
    %21 = vector.broadcast %20 : vector<1x128xf32> to vector<8x128xf32>
    %22 = vector.broadcast %cst_9 : f32 to vector<8x128xf32>
    %23 = arith.select %19, %21, %22 : vector<8x128xi1>, vector<8x128xf32>
    %24 = vector.shape_cast %11 : vector<1x128xf32> to vector<1x128xf32>
    %25 = vector.broadcast %24 : vector<1x128xf32> to vector<8x128xf32>
    %26 = arith.select %17, %25, %23 : vector<8x128xi1>, vector<8x128xf32>
    %c0_10 = arith.constant 0 : index
    %c0_11 = arith.constant 0 : index
    %27 = vector.load %arg5[%c0_10, %c0_11] : memref<8x128xf32, #tpu.memory_space<vmem>>, vector<8x128xf32>
    tpu.vector_store %arg5[%c0_10, %c0_11], %26 {strides = array<i32>} : memref<8x128xf32, #tpu.memory_space<vmem>>, vector<8x128xf32>,
    return
  }
  func.func @transform_0(%arg0: i32) -> (i32, i32) {
    %c0_i32 = arith.constant 0 : i32
    %c0_i32_0 = arith.constant 0 : i32
    return %arg0, %c0_i32 : i32, i32
  }
  func.func @transform_1(%arg0: i32) -> (i32, i32) {
    %c0_i32 = arith.constant 0 : i32
    %c0_i32_0 = arith.constant 0 : i32
    %c0_i32_1 = arith.constant 0 : i32
    return %c0_i32, %c0_i32_0 : i32, i32
  }
  func.func @transform_2(%arg0: i32) -> (i32, i32) {
    %c0_i32 = arith.constant 0 : i32
    %c0_i32_0 = arith.constant 0 : i32
    %c0_i32_1 = arith.constant 0 : i32
    return %c0_i32, %c0_i32_0 : i32, i32
  }
  func.func @transform_3(%arg0: i32) -> (i32, i32) {
    %c0_i32 = arith.constant 0 : i32
    %c0_i32_0 = arith.constant 0 : i32
    return %arg0, %c0_i32 : i32, i32
  }
  func.func @transform_4(%arg0: i32) -> (i32, i32) {
    %c0_i32 = arith.constant 0 : i32
    %c0_i32_0 = arith.constant 0 : i32
    return %arg0, %c0_i32 : i32, i32
  }
}

module attributes {stable_mosaic.version = 11 : i64} {
  func.func @_conv_mm_stats_kernel(%arg0: i32, %arg1: memref<16x256xbf16, #tpu.memory_space<vmem>>, %arg2: memref<256x128xbf16, #tpu.memory_space<vmem>>, %arg3: memref<1x128xf32, #tpu.memory_space<vmem>>, %arg4: memref<16x128xbf16, #tpu.memory_space<vmem>>, %arg5: memref<8x128xf32, #tpu.memory_space<vmem>>) attributes {dimension_semantics = [#tpu.dimension_semantics<parallel>], iteration_bounds = array<i64: 2>, scalar_prefetch = 0 : i64, scratch_operands = 0 : i64, tpu.core_type = #tpu.core_type<tc>, window_params = [{transform_indices = @transform_0, window_bounds = array<i64: 16, 256>}, {pipeline_mode = #tpu.pipeline_mode<synchronous>, transform_indices = @transform_1, window_bounds = array<i64: 256, 128>}, {pipeline_mode = #tpu.pipeline_mode<synchronous>, transform_indices = @transform_2, window_bounds = array<i64: 1, 128>}, {transform_indices = @transform_3, window_bounds = array<i64: 16, 128>}, {transform_indices = @transform_4, window_bounds = array<i64: 8, 128>}]} {
    %c0 = arith.constant 0 : index
    %c0_0 = arith.constant 0 : index
    %0 = vector.load %arg1[%c0, %c0_0] : memref<16x256xbf16, #tpu.memory_space<vmem>>, vector<16x256xbf16>
    %c0_1 = arith.constant 0 : index
    %c0_2 = arith.constant 0 : index
    %1 = vector.load %arg2[%c0_1, %c0_2] : memref<256x128xbf16, #tpu.memory_space<vmem>>, vector<256x128xbf16>
    %cst = arith.constant dense<0.000000e+00> : vector<16x128xf32>
    %2 = tpu.matmul %0, %1, %cst {dimension_numbers = #tpu.dot_dimension_numbers<[1], [0], [0], [1], [0, 0, 1, 1], [], []>} : vector<16x256xbf16>, vector<256x128xbf16>, vector<16x128xf32> -> vector<16x128xf32>
    %c0_3 = arith.constant 0 : index
    %c0_4 = arith.constant 0 : index
    %3 = vector.load %arg3[%c0_3, %c0_4] : memref<1x128xf32, #tpu.memory_space<vmem>>, vector<1x128xf32>
    %4 = vector.broadcast %3 : vector<1x128xf32> to vector<16x128xf32>
    %5 = arith.addf %2, %4 : vector<16x128xf32>
    %6 = arith.truncf %5 : vector<16x128xf32> to vector<16x128xbf16>
    %c0_5 = arith.constant 0 : index
    %c0_6 = arith.constant 0 : index
    %7 = vector.load %arg4[%c0_5, %c0_6] : memref<16x128xbf16, #tpu.memory_space<vmem>>, vector<16x128xbf16>
    tpu.vector_store %arg4[%c0_5, %c0_6], %6 {strides = array<i32>} : memref<16x128xbf16, #tpu.memory_space<vmem>>, vector<16x128xbf16>,
    %8 = vector.broadcast %3 : vector<1x128xf32> to vector<16x128xf32>
    %9 = arith.subf %5, %8 : vector<16x128xf32>
    %cst_7 = arith.constant dense<0.000000e+00> : vector<128xf32>
    %10 = vector.multi_reduction <add>, %9, %cst_7 [0] : vector<16x128xf32> to vector<128xf32>
    %11 = vector.shape_cast %10 : vector<128xf32> to vector<1x128xf32>
    %12 = arith.mulf %9, %9 : vector<16x128xf32>
    %cst_8 = arith.constant dense<0.000000e+00> : vector<128xf32>
    %13 = vector.multi_reduction <add>, %12, %cst_8 [0] : vector<16x128xf32> to vector<128xf32>
    %14 = vector.shape_cast %13 : vector<128xf32> to vector<1x128xf32>
    %15 = tpu.iota {dimensions = array<i32: 0>} : vector<8x128xi32>
    %c0_i32 = arith.constant 0 : i32
    %16 = vector.broadcast %c0_i32 : i32 to vector<8x128xi32>
    %17 = arith.cmpi eq, %15, %16 : vector<8x128xi32>
    %c1_i32 = arith.constant 1 : i32
    %18 = vector.broadcast %c1_i32 : i32 to vector<8x128xi32>
    %19 = arith.cmpi eq, %15, %18 : vector<8x128xi32>
    %cst_9 = arith.constant 0.000000e+00 : f32
    %20 = vector.shape_cast %14 : vector<1x128xf32> to vector<1x128xf32>
    %21 = vector.broadcast %20 : vector<1x128xf32> to vector<8x128xf32>
    %22 = vector.broadcast %cst_9 : f32 to vector<8x128xf32>
    %23 = arith.select %19, %21, %22 : vector<8x128xi1>, vector<8x128xf32>
    %24 = vector.shape_cast %11 : vector<1x128xf32> to vector<1x128xf32>
    %25 = vector.broadcast %24 : vector<1x128xf32> to vector<8x128xf32>
    %26 = arith.select %17, %25, %23 : vector<8x128xi1>, vector<8x128xf32>
    %c0_10 = arith.constant 0 : index
    %c0_11 = arith.constant 0 : index
    %27 = vector.load %arg5[%c0_10, %c0_11] : memref<8x128xf32, #tpu.memory_space<vmem>>, vector<8x128xf32>
    tpu.vector_store %arg5[%c0_10, %c0_11], %26 {strides = array<i32>} : memref<8x128xf32, #tpu.memory_space<vmem>>, vector<8x128xf32>,
    return
  }
  func.func @transform_0(%arg0: i32) -> (i32, i32) {
    %c0_i32 = arith.constant 0 : i32
    %c0_i32_0 = arith.constant 0 : i32
    return %arg0, %c0_i32 : i32, i32
  }
  func.func @transform_1(%arg0: i32) -> (i32, i32) {
    %c0_i32 = arith.constant 0 : i32
    %c0_i32_0 = arith.constant 0 : i32
    %c0_i32_1 = arith.constant 0 : i32
    return %c0_i32, %c0_i32_0 : i32, i32
  }
  func.func @transform_2(%arg0: i32) -> (i32, i32) {
    %c0_i32 = arith.constant 0 : i32
    %c0_i32_0 = arith.constant 0 : i32
    %c0_i32_1 = arith.constant 0 : i32
    return %c0_i32, %c0_i32_0 : i32, i32
  }
  func.func @transform_3(%arg0: i32) -> (i32, i32) {
    %c0_i32 = arith.constant 0 : i32
    %c0_i32_0 = arith.constant 0 : i32
    return %arg0, %c0_i32 : i32, i32
  }
  func.func @transform_4(%arg0: i32) -> (i32, i32) {
    %c0_i32 = arith.constant 0 : i32
    %c0_i32_0 = arith.constant 0 : i32
    return %arg0, %c0_i32 : i32, i32
  }
}

module attributes {stable_mosaic.version = 11 : i64} {
  func.func @_conv_mm_stats_kernel(%arg0: i32, %arg1: memref<8x512xbf16, #tpu.memory_space<vmem>>, %arg2: memref<512x128xbf16, #tpu.memory_space<vmem>>, %arg3: memref<1x128xf32, #tpu.memory_space<vmem>>, %arg4: memref<8x128xbf16, #tpu.memory_space<vmem>>, %arg5: memref<8x128xf32, #tpu.memory_space<vmem>>) attributes {dimension_semantics = [#tpu.dimension_semantics<parallel>], iteration_bounds = array<i64: 1>, scalar_prefetch = 0 : i64, scratch_operands = 0 : i64, tpu.core_type = #tpu.core_type<tc>, window_params = [{transform_indices = @transform_0, window_bounds = array<i64: 8, 512>}, {pipeline_mode = #tpu.pipeline_mode<synchronous>, transform_indices = @transform_1, window_bounds = array<i64: 512, 128>}, {pipeline_mode = #tpu.pipeline_mode<synchronous>, transform_indices = @transform_2, window_bounds = array<i64: 1, 128>}, {transform_indices = @transform_3, window_bounds = array<i64: 8, 128>}, {transform_indices = @transform_4, window_bounds = array<i64: 8, 128>}]} {
    %c0 = arith.constant 0 : index
    %c0_0 = arith.constant 0 : index
    %0 = vector.load %arg1[%c0, %c0_0] : memref<8x512xbf16, #tpu.memory_space<vmem>>, vector<8x512xbf16>
    %c0_1 = arith.constant 0 : index
    %c0_2 = arith.constant 0 : index
    %1 = vector.load %arg2[%c0_1, %c0_2] : memref<512x128xbf16, #tpu.memory_space<vmem>>, vector<512x128xbf16>
    %cst = arith.constant dense<0.000000e+00> : vector<8x128xf32>
    %2 = tpu.matmul %0, %1, %cst {dimension_numbers = #tpu.dot_dimension_numbers<[1], [0], [0], [1], [0, 0, 1, 1], [], []>} : vector<8x512xbf16>, vector<512x128xbf16>, vector<8x128xf32> -> vector<8x128xf32>
    %c0_3 = arith.constant 0 : index
    %c0_4 = arith.constant 0 : index
    %3 = vector.load %arg3[%c0_3, %c0_4] : memref<1x128xf32, #tpu.memory_space<vmem>>, vector<1x128xf32>
    %4 = vector.broadcast %3 : vector<1x128xf32> to vector<8x128xf32>
    %5 = arith.addf %2, %4 : vector<8x128xf32>
    %6 = arith.truncf %5 : vector<8x128xf32> to vector<8x128xbf16>
    %c0_5 = arith.constant 0 : index
    %c0_6 = arith.constant 0 : index
    %7 = vector.load %arg4[%c0_5, %c0_6] : memref<8x128xbf16, #tpu.memory_space<vmem>>, vector<8x128xbf16>
    tpu.vector_store %arg4[%c0_5, %c0_6], %6 {strides = array<i32>} : memref<8x128xbf16, #tpu.memory_space<vmem>>, vector<8x128xbf16>,
    %8 = vector.broadcast %3 : vector<1x128xf32> to vector<8x128xf32>
    %9 = arith.subf %5, %8 : vector<8x128xf32>
    %cst_7 = arith.constant dense<0.000000e+00> : vector<128xf32>
    %10 = vector.multi_reduction <add>, %9, %cst_7 [0] : vector<8x128xf32> to vector<128xf32>
    %11 = vector.shape_cast %10 : vector<128xf32> to vector<1x128xf32>
    %12 = arith.mulf %9, %9 : vector<8x128xf32>
    %cst_8 = arith.constant dense<0.000000e+00> : vector<128xf32>
    %13 = vector.multi_reduction <add>, %12, %cst_8 [0] : vector<8x128xf32> to vector<128xf32>
    %14 = vector.shape_cast %13 : vector<128xf32> to vector<1x128xf32>
    %15 = tpu.iota {dimensions = array<i32: 0>} : vector<8x128xi32>
    %c0_i32 = arith.constant 0 : i32
    %16 = vector.broadcast %c0_i32 : i32 to vector<8x128xi32>
    %17 = arith.cmpi eq, %15, %16 : vector<8x128xi32>
    %c1_i32 = arith.constant 1 : i32
    %18 = vector.broadcast %c1_i32 : i32 to vector<8x128xi32>
    %19 = arith.cmpi eq, %15, %18 : vector<8x128xi32>
    %cst_9 = arith.constant 0.000000e+00 : f32
    %20 = vector.shape_cast %14 : vector<1x128xf32> to vector<1x128xf32>
    %21 = vector.broadcast %20 : vector<1x128xf32> to vector<8x128xf32>
    %22 = vector.broadcast %cst_9 : f32 to vector<8x128xf32>
    %23 = arith.select %19, %21, %22 : vector<8x128xi1>, vector<8x128xf32>
    %24 = vector.shape_cast %11 : vector<1x128xf32> to vector<1x128xf32>
    %25 = vector.broadcast %24 : vector<1x128xf32> to vector<8x128xf32>
    %26 = arith.select %17, %25, %23 : vector<8x128xi1>, vector<8x128xf32>
    %c0_10 = arith.constant 0 : index
    %c0_11 = arith.constant 0 : index
    %27 = vector.load %arg5[%c0_10, %c0_11] : memref<8x128xf32, #tpu.memory_space<vmem>>, vector<8x128xf32>
    tpu.vector_store %arg5[%c0_10, %c0_11], %26 {strides = array<i32>} : memref<8x128xf32, #tpu.memory_space<vmem>>, vector<8x128xf32>,
    return
  }
  func.func @transform_0(%arg0: i32) -> (i32, i32) {
    %c0_i32 = arith.constant 0 : i32
    %c0_i32_0 = arith.constant 0 : i32
    return %arg0, %c0_i32 : i32, i32
  }
  func.func @transform_1(%arg0: i32) -> (i32, i32) {
    %c0_i32 = arith.constant 0 : i32
    %c0_i32_0 = arith.constant 0 : i32
    %c0_i32_1 = arith.constant 0 : i32
    return %c0_i32, %c0_i32_0 : i32, i32
  }
  func.func @transform_2(%arg0: i32) -> (i32, i32) {
    %c0_i32 = arith.constant 0 : i32
    %c0_i32_0 = arith.constant 0 : i32
    %c0_i32_1 = arith.constant 0 : i32
    return %c0_i32, %c0_i32_0 : i32, i32
  }
  func.func @transform_3(%arg0: i32) -> (i32, i32) {
    %c0_i32 = arith.constant 0 : i32
    %c0_i32_0 = arith.constant 0 : i32
    return %arg0, %c0_i32 : i32, i32
  }
  func.func @transform_4(%arg0: i32) -> (i32, i32) {
    %c0_i32 = arith.constant 0 : i32
    %c0_i32_0 = arith.constant 0 : i32
    return %arg0, %c0_i32 : i32, i32
  }
}

module attributes {stable_mosaic.version = 11 : i64} {
  func.func @_conv_mm_kernel(%arg0: i32, %arg1: memref<8x1024xbf16, #tpu.memory_space<vmem>>, %arg2: memref<1024x128xbf16, #tpu.memory_space<vmem>>, %arg3: memref<1x128xf32, #tpu.memory_space<vmem>>, %arg4: memref<8x128xf32, #tpu.memory_space<vmem>>) attributes {dimension_semantics = [#tpu.dimension_semantics<parallel>], iteration_bounds = array<i64: 1>, scalar_prefetch = 0 : i64, scratch_operands = 0 : i64, tpu.core_type = #tpu.core_type<tc>, window_params = [{transform_indices = @transform_0, window_bounds = array<i64: 8, 1024>}, {pipeline_mode = #tpu.pipeline_mode<synchronous>, transform_indices = @transform_1, window_bounds = array<i64: 1024, 128>}, {pipeline_mode = #tpu.pipeline_mode<synchronous>, transform_indices = @transform_2, window_bounds = array<i64: 1, 128>}, {transform_indices = @transform_3, window_bounds = array<i64: 8, 128>}]} {
    %c0 = arith.constant 0 : index
    %c0_0 = arith.constant 0 : index
    %0 = vector.load %arg1[%c0, %c0_0] : memref<8x1024xbf16, #tpu.memory_space<vmem>>, vector<8x1024xbf16>
    %c0_1 = arith.constant 0 : index
    %c0_2 = arith.constant 0 : index
    %1 = vector.load %arg2[%c0_1, %c0_2] : memref<1024x128xbf16, #tpu.memory_space<vmem>>, vector<1024x128xbf16>
    %cst = arith.constant dense<0.000000e+00> : vector<8x128xf32>
    %2 = tpu.matmul %0, %1, %cst {dimension_numbers = #tpu.dot_dimension_numbers<[1], [0], [0], [1], [0, 0, 1, 1], [], []>} : vector<8x1024xbf16>, vector<1024x128xbf16>, vector<8x128xf32> -> vector<8x128xf32>
    %c0_3 = arith.constant 0 : index
    %c0_4 = arith.constant 0 : index
    %3 = vector.load %arg3[%c0_3, %c0_4] : memref<1x128xf32, #tpu.memory_space<vmem>>, vector<1x128xf32>
    %4 = vector.broadcast %3 : vector<1x128xf32> to vector<8x128xf32>
    %5 = arith.addf %2, %4 : vector<8x128xf32>
    %cst_5 = arith.constant 0.000000e+00 : f32
    %6 = vector.broadcast %cst_5 : f32 to vector<8x128xf32>
    %7 = arith.subf %6, %5 : vector<8x128xf32>
    %8 = math.exp %7 : vector<8x128xf32>
    %cst_6 = arith.constant 1.000000e+00 : f32
    %9 = vector.broadcast %cst_6 : f32 to vector<8x128xf32>
    %10 = arith.addf %9, %8 : vector<8x128xf32>
    %cst_7 = arith.constant 1.000000e+00 : f32
    %11 = vector.broadcast %cst_7 : f32 to vector<8x128xf32>
    %12 = arith.divf %11, %10 : vector<8x128xf32>
    %c0_8 = arith.constant 0 : index
    %c0_9 = arith.constant 0 : index
    %13 = vector.load %arg4[%c0_8, %c0_9] : memref<8x128xf32, #tpu.memory_space<vmem>>, vector<8x128xf32>
    tpu.vector_store %arg4[%c0_8, %c0_9], %12 {strides = array<i32>} : memref<8x128xf32, #tpu.memory_space<vmem>>, vector<8x128xf32>,
    return
  }
  func.func @transform_0(%arg0: i32) -> (i32, i32) {
    %c0_i32 = arith.constant 0 : i32
    %c0_i32_0 = arith.constant 0 : i32
    return %arg0, %c0_i32 : i32, i32
  }
  func.func @transform_1(%arg0: i32) -> (i32, i32) {
    %c0_i32 = arith.constant 0 : i32
    %c0_i32_0 = arith.constant 0 : i32
    %c0_i32_1 = arith.constant 0 : i32
    return %c0_i32, %c0_i32_0 : i32, i32
  }
  func.func @transform_2(%arg0: i32) -> (i32, i32) {
    %c0_i32 = arith.constant 0 : i32
    %c0_i32_0 = arith.constant 0 : i32
    %c0_i32_1 = arith.constant 0 : i32
    return %c0_i32, %c0_i32_0 : i32, i32
  }
  func.func @transform_3(%arg0: i32) -> (i32, i32) {
    %c0_i32 = arith.constant 0 : i32
    %c0_i32_0 = arith.constant 0 : i32
    return %arg0, %c0_i32 : i32, i32
  }
}

</mosaic_0001>

<bundles_post_ra>
// kernel: turbnet_d_forward.5
= control target key start
LH: loop header
LB: loop body
LE: loop exit
PB: predicated region body
PF: predicated region fallthrough
CT: control target
= control target key end

     0   :  { %s766_s12 = smov 0   ;;  %s837_s0 = inlined_call_operand.vmem [shape: bf16[256,128], index: 0, kind: input, shape index: {}]   ;;  %s838_s1 = inlined_call_operand.vmem [shape: bf16[128,128], index: 1, kind: input, shape index: {}]   ;;  %s839_s2 = inlined_call_operand.vmem [shape: f32[1,128], index: 2, kind: input, shape index: {}]   ;;  %s840_s3 = inlined_call_operand.vmem [shape: bf16[256,128], index: 3, kind: output, shape index: {}]  }
   0x1 LB: > { %s543_s13 = sadd.s32 4294967295, %s744_s12   ;;  %p547_p0 = scmp.ge.s32.totalorder %s744_s12, 1  ;;  %s744_s12 = sphi %s766_s12, %s13_s12  }
   0x2   : > { %p138_p1 = scmp.lt.s32.totalorder %s744_s12, 3 }
   0x4   : > { %p139_p2 = pnand %p547_p0, %p138_p1 }
   0x5   : > { %v722_v0 = vld [vmem:[%s838_s1] sm:$0xff] (!%p139_p2)   ;;  %s548_s16 = sshll.u32 (!%p139_p2), %s543_s13, 4  ;;  %v723_v1 = vld [vmem:[%s838_s1 + $0x8] sm:$0xff] (!%p139_p2)   ;;  %v724_v2 = vld [vmem:[%s838_s1 + $0x10] sm:$0xff] (!%p139_p2)  }
   0x6   : > { %142 = sbr.rel (%p139_p2) target bundleno = 266 (0x10a), region = 32  ;;  %p163_p3 = scmp.lt.s32.totalorder (!%p139_p2), %s548_s16, 31  ;;  %666 = vmatprep.subr.bf16.mxu0 (!%p139_p2), %v722_v0  ;;  %698 = vmatprep.subr.bf16.mxu1 (!%p139_p2), %v722_v0  ;;  %v725_v3 = vld [vmem:[%s838_s1 + $0x18] sm:$0xff] (!%p139_p2)   ;;  %v726_v6 = vld [vmem:[%s838_s1 + $0x20] sm:$0xff] (!%p139_p2)   ;;  %v727_v7 = vld [vmem:[%s838_s1 + $0x28] sm:$0xff] (!%p139_p2)  }
   0x7   : > { %667 = vmatpush3.bf16.msra.mxu0 (!%p139_p2), %v722_v0  ;;  %706 = vmatpush3.bf16.msra.mxu1 (!%p139_p2), %v722_v0  ;;  %v728_v8 = vld [vmem:[%s838_s1 + $0x30] sm:$0xff] (!%p139_p2)   ;;  %v729_v9 = vld [vmem:[%s838_s1 + $0x38] sm:$0xff] (!%p139_p2)   ;;  %v552_v17 = vld [vmem:[%s839_s2] ss:$0 sm:$0xff] (!%p139_p2) }
   0x8   : > { %668 = vmatprep.subr.bf16.mxu0 (!%p139_p2), %v723_v1  ;;  %699 = vmatprep.subr.bf16.mxu1 (!%p139_p2), %v723_v1 }
   0xb   : > { %669 = vmatpush3.bf16.msra.mxu0 (!%p139_p2), %v723_v1  ;;  %707 = vmatpush3.bf16.msra.mxu1 (!%p139_p2), %v723_v1 }
   0xc   : > { %670 = vmatprep.subr.bf16.mxu0 (!%p139_p2), %v724_v2  ;;  %700 = vmatprep.subr.bf16.mxu1 (!%p139_p2), %v724_v2 }
   0xd   : > { %s842_s16 = smov (!%p163_p3, %s548_s16), 31 }
   0xe   : > { %s549_s21 = sshll.u32 %s842_s16, 2 }
   0xf   : > { %s791_s24 = scalar_lea.vmem %s837_s0, %s549_s21  ;;  %671 = vmatpush3.bf16.msra.mxu0 %v724_v2  ;;  %708 = vmatpush3.bf16.msra.mxu1 %v724_v2  ;;  %s824_s13 = scalar_lea.vmem %s840_s3, %s549_s21 }
  0x10   : > { %v730_v4 = vld [vmem:[%s791_s24] sm:$0xff]   ;;  %672 = vmatprep.subr.bf16.mxu0 %v725_v3  ;;  %701 = vmatprep.subr.bf16.mxu1 %v725_v3  ;;  %v732_v10 = vld [vmem:[%s791_s24 + $0x8] sm:$0xff]   ;;  %v734_v12 = vld [vmem:[%s791_s24 + $0x10] sm:$0xff]  }
  0x11   : > { %v731_v5 = vld [vmem:[%s791_s24 + $0x20] sm:$0xff]   ;;  %682 = vmatprep.mubr.bf16.mxu0 %v730_v4  ;;  %v733_v11 = vld [vmem:[%s791_s24 + $0x28] sm:$0xff]   ;;  %v735_v13 = vld [vmem:[%s791_s24 + $0x30] sm:$0xff]  }
  0x12   : > { %690 = vmatprep.mubr.bf16.mxu1 %v731_v5  ;;  %v736_v14 = vld [vmem:[%s791_s24 + $0x18] sm:$0xff]  }
  0x13   : > { %673 = vmatpush3.bf16.msra.mxu0 %v725_v3  ;;  %709 = vmatpush3.bf16.msra.mxu1 %v725_v3  ;;  %v737_v15 = vld [vmem:[%s791_s24 + $0x38] sm:$0xff]  }
  0x14   : > { %674 = vmatprep.subr.bf16.mxu0 %v726_v6  ;;  %702 = vmatprep.subr.bf16.mxu1 %v726_v6 }
  0x17   : > { %675 = vmatpush3.bf16.msra.mxu0 %v726_v6  ;;  %710 = vmatpush3.bf16.msra.mxu1 %v726_v6 }
  0x18   : > { %676 = vmatprep.subr.bf16.mxu0 %v727_v7  ;;  %703 = vmatprep.subr.bf16.mxu1 %v727_v7 }
  0x1b   : > { %677 = vmatpush3.bf16.msra.mxu0 %v727_v7  ;;  %711 = vmatpush3.bf16.msra.mxu1 %v727_v7 }
  0x1c   : > { %678 = vmatprep.subr.bf16.mxu0 %v728_v8  ;;  %704 = vmatprep.subr.bf16.mxu1 %v728_v8 }
  0x1f   : > { %679 = vmatpush3.bf16.msra.mxu0 %v728_v8  ;;  %712 = vmatpush3.bf16.msra.mxu1 %v728_v8 }
  0x20   : > { %680 = vmatprep.subr.bf16.mxu0 %v729_v9  ;;  %705 = vmatprep.subr.bf16.mxu1 %v729_v9 }
  0x23   : > { %681 = vmatpush3.bf16.msra.mxu0 %v729_v9  ;;  %713 = vmatpush3.bf16.msra.mxu1 %v729_v9 }
  0x26   : > { %683 = vmatmul.mubr.bf16.vlgmr.msra.gmra.mrb[0].mxu0 %v732_v10  ;;  %691 = vmatmul.mubr.bf16.vlgmr.msra.gmra.mrb[0].mxu1 %v733_v11 }
  0x27   : > { %686 = vmatprep.mubr.bf16.mxu0 %v734_v12  ;;  %694 = vmatprep.mubr.bf16.mxu1 %v735_v13 }
  0x2e   : > { %687 = vmatmul.mubr.bf16.gmra.mrb[4].mxu0 %v736_v14  ;;  %695 = vmatmul.mubr.bf16.gmra.mrb[4].mxu1 %v737_v15 }
  0xf9   : > { %v684_v16 = vpop.f32.mrb[0].mxu0  ;;  %v692_v18 = vpop.f32.mrb[0].mxu1 }
  0xfa   : > { %v344_v19 = vpop.f32.mrb[1].mxu0  ;;  %v376_v20 = vpop.f32.mrb[1].mxu1  ;;  %v353_v23 = vadd.f32 %v684_v16, %v552_v17  ;;  %v385_v24 = vadd.f32 %v692_v18, %v552_v17 }
  0xfb   : > { %v685_v21 = vpop.f32.mrb[2].mxu0  ;;  %v693_v22 = vpop.f32.mrb[2].mxu1  ;;  %v345_v29 = vadd.f32 %v552_v17, %v344_v19  ;;  %v377_v30 = vadd.f32 %v552_v17, %v376_v20 }
  0xfc   : > { %v356_v25 = vadd.f32 %v685_v21, %v552_v17  ;;  %v388_v26 = vadd.f32 %v693_v22, %v552_v17  ;;  %v347_v27 = vpop.f32.mrb[3].mxu0  ;;  %v379_v28 = vpop.f32.mrb[3].mxu1 }
  0xfd   : > { %v348_v31 = vadd.f32 %v552_v17, %v347_v27  ;;  %v380_v32 = vadd.f32 %v552_v17, %v379_v28 }
  0xfe   : > { %v611_v33 = vpack.c.bf16 %v356_v25, %v353_v23  ;;  %v631_v34 = vpack.c.bf16 %v388_v26, %v385_v24 }
  0xff   : > { %v606_v35 = vpack.c.bf16 %v348_v31, %v345_v29  ;;  %v626_v36 = vpack.c.bf16 %v380_v32, %v377_v30 }
 0x100   : > { %643 = vst [vmem:[%s824_s13 + $0x8] sm:$0xff] %v611_v33   ;;  %647 = vst [vmem:[%s824_s13 + $0x28] sm:$0xff] %v631_v34  }
 0x101   : > { %607 = vst [vmem:[%s824_s13] sm:$0xff] %v606_v35   ;;  %646 = vst [vmem:[%s824_s13 + $0x20] sm:$0xff] %v626_v36   ;;  %v688_v37 = vpop.f32.mrb[4].mxu0  ;;  %v696_v38 = vpop.f32.mrb[4].mxu1 }
 0x102   : > { %v360_v39 = vpop.f32.mrb[5].mxu0  ;;  %v392_v40 = vpop.f32.mrb[5].mxu1  ;;  %v369_v43 = vadd.f32 %v688_v37, %v552_v17  ;;  %v401_v44 = vadd.f32 %v696_v38, %v552_v17 }
 0x103   : > { %v689_v41 = vpop.f32.mrb[6].mxu0  ;;  %v697_v42 = vpop.f32.mrb[6].mxu1  ;;  %v361_v49 = vadd.f32 %v552_v17, %v360_v39  ;;  %v393_v50 = vadd.f32 %v552_v17, %v392_v40 }
 0x104   : > { %v372_v45 = vadd.f32 %v689_v41, %v552_v17  ;;  %v404_v46 = vadd.f32 %v697_v42, %v552_v17  ;;  %v363_v47 = vpop.f32.mrb[7].mxu0  ;;  %v395_v48 = vpop.f32.mrb[7].mxu1 }
 0x105   : > { %v364_v51 = vadd.f32 %v552_v17, %v363_v47  ;;  %v396_v52 = vadd.f32 %v552_v17, %v395_v48 }
 0x106   : > { %v621_v53 = vpack.c.bf16 %v372_v45, %v369_v43  ;;  %v641_v54 = vpack.c.bf16 %v404_v46, %v401_v44 }
 0x107   : > { %v616_v55 = vpack.c.bf16 %v364_v51, %v361_v49  ;;  %v636_v56 = vpack.c.bf16 %v396_v52, %v393_v50 }
 0x108   : > { %645 = vst [vmem:[%s824_s13 + $0x18] sm:$0xff] %v621_v53   ;;  %649 = vst [vmem:[%s824_s13 + $0x38] sm:$0xff] %v641_v54  }
 0x109   : > { %644 = vst [vmem:[%s824_s13 + $0x10] sm:$0xff] %v616_v55   ;;  %648 = vst [vmem:[%s824_s13 + $0x30] sm:$0xff] %v636_v56  }
 0x10a PF: > { %s13_s12 = sadd.s32 1, %s744_s12  }
 0x10b   : > { %p10_p4 = scmp.ge.s32.totalorder %s13_s12, 4  }
 0x10d   :  { %12 = sbr.rel (!%p10_p4) target bundleno = 1 (0x1), region = 62 }

// kernel: turbnet_d_forward.6
= control target key start
LH: loop header
LB: loop body
LE: loop exit
PB: predicated region body
PF: predicated region fallthrough
CT: control target
= control target key end

     0   :  { %s612_s15 = smov 0   ;;  %s671_s0 = inlined_call_operand.vmem [shape: bf16[64,128], index: 0, kind: input, shape index: {}]   ;;  %s672_s1 = inlined_call_operand.vmem [shape: bf16[128,128], index: 1, kind: input, shape index: {}]   ;;  %s673_s2 = inlined_call_operand.vmem [shape: f32[1,128], index: 2, kind: input, shape index: {}]   ;;  %s674_s3 = inlined_call_operand.vmem [shape: bf16[64,128], index: 3, kind: output, shape index: {0}]   ;;  %s675_s4 = inlined_call_operand.vmem [shape: f32[16,128], index: 4, kind: output, shape index: {1}]  }
   0x1 LB: > { %s618_s16 = sadd.s32 4294967295, %s585_s15   ;;  %p493_p0 = scmp.ge.s32.totalorder %s585_s15, 1  ;;  %s585_s15 = sphi %s612_s15, %s15_s15  }
   0x2   : > { %p166_p1 = scmp.lt.s32.totalorder %s585_s15, 3 }
   0x4   : > { %p167_p2 = pnand %p493_p0, %p166_p1 }
   0x5   : > { %v569_v0 = vld [vmem:[%s672_s1] sm:$0xff] (!%p167_p2)   ;;  %s494_s19 = sshll.u32 (!%p167_p2), %s618_s16, 2  ;;  %v570_v1 = vld [vmem:[%s672_s1 + $0x8] sm:$0xff] (!%p167_p2)   ;;  %v571_v2 = vld [vmem:[%s672_s1 + $0x10] sm:$0xff] (!%p167_p2)   ;;  %p208_p4 = scmp.lt.s32.totalorder (!%p167_p2), %s618_s16, 1  ;;  %v395_v38 = vlaneseq (!%p167_p2) }
   0x6   : > { %170 = sbr.rel (%p167_p2) target bundleno = 280 (0x118), region = 32  ;;  %p197_p3 = scmp.lt.s32.totalorder (!%p167_p2), %s494_s19, 7  ;;  %541 = vmatprep.subr.bf16.mxu0 (!%p167_p2), %v569_v0  ;;  %v572_v3 = vld [vmem:[%s672_s1 + $0x18] sm:$0xff] (!%p167_p2)   ;;  %v573_v5 = vld [vmem:[%s672_s1 + $0x20] sm:$0xff] (!%p167_p2)   ;;  %v574_v6 = vld [vmem:[%s672_s1 + $0x28] sm:$0xff] (!%p167_p2)  }
   0x7   : > { %542 = vmatpush3.bf16.msra.mxu0 (!%p167_p2), %v569_v0  ;;  %v575_v7 = vld [vmem:[%s672_s1 + $0x30] sm:$0xff] (!%p167_p2)   ;;  %v576_v8 = vld [vmem:[%s672_s1 + $0x38] sm:$0xff] (!%p167_p2)   ;;  %v499_v10 = vld [vmem:[%s673_s2] ss:$0 sm:$0xff] (!%p167_p2)  ;;  %v396_v43 = vshrl.u32 (!%p167_p2), %v395_v38, 7 }
   0x8   : > { %543 = vmatprep.subr.bf16.mxu0 (!%p167_p2), %v570_v1 }
   0x9   : > { %vm398_vm0 = vcmp.eq.s32.totalorder (!%p167_p2), %v396_v43, 1  ;;  %vm397_vm1 = vcmp.eq.s32.totalorder (!%p167_p2), %v396_v43, 0 }
   0xb   : > { %544 = vmatpush3.bf16.msra.mxu0 (!%p167_p2), %v570_v1 }
   0xc   : > { %545 = vmatprep.subr.bf16.mxu0 (!%p167_p2), %v571_v2 }
   0xd   : > { %s677_s19 = smov (!%p197_p3, %s494_s19), 7  ;;  %s679_s16 = smov (!%p208_p4, %s618_s16), 1 }
   0xe   : > { %s495_s24 = sshll.u32 %s677_s19, 2  ;;  %s498_s19 = sshll.u32 %s679_s16, 3 }
   0xf   : > { %s200_s27 = scalar_lea.vmem %s671_s0, %s495_s24  ;;  %546 = vmatpush3.bf16.msra.mxu0 %v571_v2  ;;  %s206_s18 = scalar_lea.vmem %s674_s3, %s495_s24 }
  0x10   : > { %v577_v4 = vld [vmem:[%s200_s27] sm:$0xff]   ;;  %547 = vmatprep.subr.bf16.mxu0 %v572_v3  ;;  %v578_v9 = vld [vmem:[%s200_s27 + $0x8] sm:$0xff]   ;;  %s211_s22 = scalar_lea.vmem %s675_s4, %s498_s19 }
  0x11   : > { %557 = vmatprep.mubr.bf16.mxu0 %v577_v4 }
  0x13   : > { %548 = vmatpush3.bf16.msra.mxu0 %v572_v3 }
  0x14   : > { %549 = vmatprep.subr.bf16.mxu0 %v573_v5 }
  0x17   : > { %550 = vmatpush3.bf16.msra.mxu0 %v573_v5 }
  0x18   : > { %551 = vmatprep.subr.bf16.mxu0 %v574_v6 }
  0x1b   : > { %552 = vmatpush3.bf16.msra.mxu0 %v574_v6 }
  0x1c   : > { %553 = vmatprep.subr.bf16.mxu0 %v575_v7 }
  0x1f   : > { %554 = vmatpush3.bf16.msra.mxu0 %v575_v7 }
  0x20   : > { %555 = vmatprep.subr.bf16.mxu0 %v576_v8 }
  0x23   : > { %556 = vmatpush3.bf16.msra.mxu0 %v576_v8 }
  0x26   : > { %558 = vmatmul.mubr.bf16.vlgmr.msra.gmra.mrb[0].mxu0 %v578_v9 }
  0xf9   : > { %v559_v11 = vpop.f32.mrb[0].mxu0 }
  0xfa   : > { %v334_v12 = vpop.f32.mrb[1].mxu0  ;;  %v343_v13 = vadd.f32 %v559_v11, %v499_v10 }
  0xfb   : > { %v335_v14 = vadd.f32 %v499_v10, %v334_v12  ;;  %v560_v15 = vpop.f32.mrb[2].mxu0 }
  0xfc   : > { %v346_v16 = vadd.f32 %v560_v15, %v499_v10  ;;  %v337_v17 = vpop.f32.mrb[3].mxu0  ;;  %v371_v21 = vsub.f32 %v343_v13, %v499_v10 }
  0xfd   : > { %v369_v18 = vsub.f32 %v335_v14, %v499_v10  ;;  %v338_v19 = vadd.f32 %v499_v10, %v337_v17 }
  0xfe   : > { %v528_v20 = vpack.c.bf16 %v346_v16, %v343_v13  ;;  %v372_v25 = vsub.f32 %v346_v16, %v499_v10  ;;  %v384_v28 = vmul.f32 %v371_v21, %v371_v21 }
  0xff   : > { %v523_v22 = vpack.c.bf16 %v338_v19, %v335_v14  ;;  %v370_v23 = vsub.f32 %v338_v19, %v499_v10  ;;  %v382_v24 = vmul.f32 %v369_v18, %v369_v18 }
 0x100   : > { %530 = vst [vmem:[%s206_s18 + $0x8] sm:$0xff] %v528_v20   ;;  %v385_v31 = vmul.f32 %v372_v25, %v372_v25 }
 0x101   : > { %524 = vst [vmem:[%s206_s18] sm:$0xff] %v523_v22   ;;  %v373_v26 = vadd.f32 %v370_v23, %v369_v18  ;;  %v383_v27 = vmul.f32 %v370_v23, %v370_v23 }
 0x103   : > { %v374_v29 = vadd.f32 %v373_v26, %v371_v21  ;;  %v386_v30 = vadd.f32 %v383_v27, %v382_v24 }
 0x105   : > { %v375_v32 = vadd.f32 %v374_v29, %v372_v25  ;;  %v387_v33 = vadd.f32 %v386_v30, %v384_v28 }
 0x107   : > { %v376_v34 = vrot.slane %v375_v32, 4  ;;  %v388_v35 = vadd.f32 %v387_v33, %v385_v31 }
 0x109   : > { %v377_v36 = vadd.f32 %v376_v34, %v375_v32  ;;  %v389_v37 = vrot.slane %v388_v35, 4 }
 0x10b   : > { %v378_v39 = vrot.slane %v377_v36, 2  ;;  %v390_v40 = vadd.f32 %v389_v37, %v388_v35 }
 0x10d   : > { %v379_v41 = vadd.f32 %v378_v39, %v377_v36  ;;  %v391_v42 = vrot.slane %v390_v40, 2 }
 0x10f   : > { %v392_v44 = vadd.f32 %v391_v42, %v390_v40  ;;  %v380_v45 = vrot.slane %v379_v41, 1 }
 0x111   : > { %v393_v46 = vrot.slane %v392_v44, 1  ;;  %v381_v48 = vadd.f32 %v380_v45, %v379_v41 }
 0x113   : > { %v394_v47 = vadd.f32 %v393_v46, %v392_v44 }
 0x115   : > { %v399_v49 = vsel %vm398_vm0, %v394_v47, 0.0 }
 0x116   : > { %v400_v50 = vsel %vm397_vm1, %v381_v48, %v399_v49 }
 0x117   : > { %401 = vst [vmem:[%s211_s22] sm:$0xff] %v400_v50 }
 0x118 PF: > { %s15_s15 = sadd.s32 1, %s585_s15  }
 0x119   : > { %p12_p5 = scmp.ge.s32.totalorder %s15_s15, 4  }
 0x11b   :  { %14 = sbr.rel (!%p12_p5) target bundleno = 1 (0x1), region = 74 }

// kernel: turbnet_d_forward.7
= control target key start
LH: loop header
LB: loop body
LE: loop exit
PB: predicated region body
PF: predicated region fallthrough
CT: control target
= control target key end

     0   :  { %s650_s15 = smov 0   ;;  %s730_s0 = inlined_call_operand.vmem [shape: bf16[32,256], index: 0, kind: input, shape index: {}]   ;;  %s731_s1 = inlined_call_operand.vmem [shape: bf16[256,128], index: 1, kind: input, shape index: {}]   ;;  %s732_s2 = inlined_call_operand.vmem [shape: f32[1,128], index: 2, kind: input, shape index: {}]   ;;  %s733_s3 = inlined_call_operand.vmem [shape: bf16[32,128], index: 3, kind: output, shape index: {0}]   ;;  %s734_s4 = inlined_call_operand.vmem [shape: f32[16,128], index: 4, kind: output, shape index: {1}]  }
   0x1 LB: > { %s656_s16 = sadd.s32 4294967295, %s623_s15   ;;  %p530_p0 = scmp.ge.s32.totalorder %s623_s15, 1  ;;  %s623_s15 = sphi %s650_s15, %s15_s15  }
   0x2   : > { %p167_p1 = scmp.lt.s32.totalorder %s623_s15, 3 }
   0x4   : > { %p168_p2 = pnand %p530_p0, %p167_p1 }
   0x5   : > { %v598_v0 = vld [vmem:[%s731_s1 + $0x40] sm:$0xff] (!%p168_p2)   ;;  %s531_s19 = sshll.u32 (!%p168_p2), %s656_s16, 1  ;;  %v600_v2 = vld [vmem:[%s731_s1 + $0x48] sm:$0xff] (!%p168_p2)   ;;  %v602_v4 = vld [vmem:[%s731_s1 + $0x50] sm:$0xff] (!%p168_p2)   ;;  %p211_p4 = scmp.lt.s32.totalorder (!%p168_p2), %s656_s16, 1  ;;  %v432_v37 = vlaneseq (!%p168_p2) }
   0x6   : > { %171 = sbr.rel (%p168_p2) target bundleno = 278 (0x116), region = 32  ;;  %v599_v1 = vld [vmem:[%s731_s1] sm:$0xff] (!%p168_p2)   ;;  %568 = vmatprep.subr.bf16.mxu0 (!%p168_p2), %v598_v0  ;;  %v601_v3 = vld [vmem:[%s731_s1 + $0x8] sm:$0xff] (!%p168_p2)   ;;  %p199_p3 = scmp.lt.s32.totalorder (!%p168_p2), %s531_s19, 3  ;;  %v603_v5 = vld [vmem:[%s731_s1 + $0x10] sm:$0xff] (!%p168_p2)  }
   0x7   : > { %569 = vmatpush3.bf16.msra.mxu0 (!%p168_p2), %v599_v1  ;;  %v604_v6 = vld [vmem:[%s731_s1 + $0x58] sm:$0xff] (!%p168_p2)   ;;  %v606_v8 = vld [vmem:[%s731_s1 + $0x60] sm:$0xff] (!%p168_p2)   ;;  %v608_v10 = vld [vmem:[%s731_s1 + $0x68] sm:$0xff] (!%p168_p2)   ;;  %v433_v42 = vshrl.u32 (!%p168_p2), %v432_v37, 7 }
   0x8   : > { %570 = vmatprep.subr.bf16.mxu0 (!%p168_p2), %v600_v2  ;;  %v605_v7 = vld [vmem:[%s731_s1 + $0x18] sm:$0xff] (!%p168_p2)   ;;  %v607_v9 = vld [vmem:[%s731_s1 + $0x20] sm:$0xff] (!%p168_p2)   ;;  %v609_v12 = vld [vmem:[%s731_s1 + $0x28] sm:$0xff] (!%p168_p2)  }
   0x9   : > { %v610_v13 = vld [vmem:[%s731_s1 + $0x70] sm:$0xff] (!%p168_p2)   ;;  %v612_v15 = vld [vmem:[%s731_s1 + $0x78] sm:$0xff] (!%p168_p2)   ;;  %v537_v19 = vld [vmem:[%s732_s2] ss:$0 sm:$0xff] (!%p168_p2)  ;;  %vm435_vm0 = vcmp.eq.s32.totalorder (!%p168_p2), %v433_v42, 1  ;;  %vm434_vm1 = vcmp.eq.s32.totalorder (!%p168_p2), %v433_v42, 0 }
   0xa   : > { %v611_v14 = vld [vmem:[%s731_s1 + $0x30] sm:$0xff] (!%p168_p2)   ;;  %v613_v16 = vld [vmem:[%s731_s1 + $0x38] sm:$0xff] (!%p168_p2)  }
   0xb   : > { %571 = vmatpush3.bf16.msra.mxu0 (!%p168_p2), %v601_v3 }
   0xc   : > { %572 = vmatprep.subr.bf16.mxu0 (!%p168_p2), %v602_v4 }
   0xd   : > { %s736_s19 = smov (!%p199_p3, %s531_s19), 3  ;;  %s738_s16 = smov (!%p211_p4, %s656_s16), 1 }
   0xe   : > { %s560_s8 = sshll.u32 %s736_s19, 3  ;;  %s535_s7 = sshll.u32 %s736_s19, 2 }
   0xf   : > { %573 = vmatpush3.bf16.msra.mxu0 %v603_v5  ;;  %s203_s13 = scalar_lea.vmem %s730_s0, %s560_s8  ;;  %s209_s10 = scalar_lea.vmem %s733_s3, %s535_s7 }
  0x10   : > { %574 = vmatprep.subr.bf16.mxu0 %v604_v6  ;;  %v616_v11 = vld [vmem:[%s203_s13 + $0x4] ss:$8 sps:$4 sm:$0xff]   ;;  %v614_v17 = vld [vmem:[%s203_s13] ss:$8 sps:$4 sm:$0xff]   ;;  %s536_s19 = sshll.u32 %s738_s16, 3 }
  0x11   : > { %395 = vmatprep.mubr.bf16.mxu0 %v616_v11  ;;  %s214_s13 = scalar_lea.vmem %s734_s4, %s536_s19 }
  0x13   : > { %575 = vmatpush3.bf16.msra.mxu0 %v605_v7 }
  0x14   : > { %576 = vmatprep.subr.bf16.mxu0 %v606_v8 }
  0x17   : > { %577 = vmatpush3.bf16.msra.mxu0 %v607_v9 }
  0x18   : > { %578 = vmatprep.subr.bf16.mxu0 %v608_v10 }
  0x1b   : > { %579 = vmatpush3.bf16.msra.mxu0 %v609_v12 }
  0x1c   : > { %580 = vmatprep.subr.bf16.mxu0 %v610_v13 }
  0x1f   : > { %581 = vmatpush3.bf16.msra.mxu0 %v611_v14 }
  0x20   : > { %582 = vmatprep.subr.bf16.mxu0 %v612_v15 }
  0x23   : > { %583 = vmatpush3.bf16.msra.mxu0 %v613_v16 }
  0x26   : > { %396 = vmatmul.mubr.bf16.vlgmr.msra.gmra.mrb[0].mxu0 %v614_v17 }
  0xf9   : > { %v584_v18 = vpop.f32.mrb[0].mxu0 }
  0xfa   : > { %v585_v20 = vpop.f32.mrb[1].mxu0 }
  0xfb   : > { %v586_v21 = vadd.f32 %v585_v20, %v584_v18  ;;  %v587_v22 = vpop.f32.mrb[2].mxu0 }
  0xfc   : > { %v588_v23 = vpop.f32.mrb[3].mxu0 }
  0xfd   : > { %v398_v24 = vadd.f32 %v586_v21, %v537_v19  ;;  %v589_v25 = vadd.f32 %v588_v23, %v587_v22 }
  0xff   : > { %v414_v26 = vsub.f32 %v398_v24, %v537_v19  ;;  %v401_v27 = vadd.f32 %v589_v25, %v537_v19 }
 0x101   : > { %v566_v28 = vpack.c.bf16 %v401_v27, %v398_v24  ;;  %v415_v29 = vsub.f32 %v401_v27, %v537_v19  ;;  %v423_v30 = vmul.f32 %v414_v26, %v414_v26 }
 0x103   : > { %567 = vst [vmem:[%s209_s10] sm:$0xff] %v566_v28   ;;  %v416_v31 = vadd.f32 %v415_v29, %v414_v26  ;;  %v424_v32 = vmul.f32 %v415_v29, %v415_v29 }
 0x105   : > { %v417_v33 = vrot.slane %v416_v31, 4  ;;  %v425_v34 = vadd.f32 %v424_v32, %v423_v30 }
 0x107   : > { %v418_v35 = vadd.f32 %v417_v33, %v416_v31  ;;  %v426_v36 = vrot.slane %v425_v34, 4 }
 0x109   : > { %v419_v38 = vrot.slane %v418_v35, 2  ;;  %v427_v39 = vadd.f32 %v426_v36, %v425_v34 }
 0x10b   : > { %v420_v40 = vadd.f32 %v419_v38, %v418_v35  ;;  %v428_v41 = vrot.slane %v427_v39, 2 }
 0x10d   : > { %v429_v43 = vadd.f32 %v428_v41, %v427_v39  ;;  %v421_v44 = vrot.slane %v420_v40, 1 }
 0x10f   : > { %v430_v45 = vrot.slane %v429_v43, 1  ;;  %v422_v47 = vadd.f32 %v421_v44, %v420_v40 }
 0x111   : > { %v431_v46 = vadd.f32 %v430_v45, %v429_v43 }
 0x113   : > { %v436_v48 = vsel %vm435_vm0, %v431_v46, 0.0 }
 0x114   : > { %v437_v49 = vsel %vm434_vm1, %v422_v47, %v436_v48 }
 0x115   : > { %438 = vst [vmem:[%s214_s13] sm:$0xff] %v437_v49 }
 0x116 PF: > { %s15_s15 = sadd.s32 1, %s623_s15  }
 0x117   : > { %p12_p5 = scmp.ge.s32.totalorder %s15_s15, 4  }
 0x119   :  { %14 = sbr.rel (!%p12_p5) target bundleno = 1 (0x1), region = 74 }

// kernel: turbnet_d_forward.8
= control target key start
LH: loop header
LB: loop body
LE: loop exit
PB: predicated region body
PF: predicated region fallthrough
CT: control target
= control target key end

     0   :  { %v392_v57 = vlaneseq  ;;  %s660_s1 = inlined_call_operand.vmem [shape: bf16[512,128], index: 1, kind: input, shape index: {}]   ;;  %s661_s0 = inlined_call_operand.vmem [shape: bf16[8,512], index: 0, kind: input, shape index: {}]   ;;  %s662_s2 = inlined_call_operand.vmem [shape: f32[1,128], index: 2, kind: input, shape index: {}]   ;;  %s663_s3 = inlined_call_operand.vmem [shape: bf16[8,128], index: 3, kind: output, shape index: {0}]   ;;  %s664_s4 = inlined_call_operand.vmem [shape: f32[8,128], index: 4, kind: output, shape index: {1}]  }
   0x1   :  { %v488_v0 = vld [vmem:[%s660_s1 + $0x40] sm:$0xff]   ;;  %v492_v4 = vld [vmem:[%s660_s1 + $0x48] sm:$0xff]   ;;  %v496_v8 = vld [vmem:[%s660_s1 + $0x50] sm:$0xff]  }
   0x2   :  { %v489_v1 = vld [vmem:[%s660_s1 + $0xc0] sm:$0xff]   ;;  %444 = vmatprep.subr.bf16.mxu0 %v488_v0  ;;  %v493_v5 = vld [vmem:[%s660_s1 + $0xc8] sm:$0xff]   ;;  %v497_v9 = vld [vmem:[%s660_s1 + $0xd0] sm:$0xff]   ;;  %v393_v62 = vshrl.u32 %v392_v57, 7 }
   0x3   :  { %v490_v2 = vld [vmem:[%s660_s1] sm:$0xff]   ;;  %466 = vmatprep.subr.bf16.mxu1 %v489_v1  ;;  %v494_v6 = vld [vmem:[%s660_s1 + $0x8] sm:$0xff]   ;;  %v498_v10 = vld [vmem:[%s660_s1 + $0x10] sm:$0xff]  }
   0x4   :  { %v491_v3 = vld [vmem:[%s660_s1 + $0x80] sm:$0xff]   ;;  %445 = vmatpush3.bf16.msra.mxu0 %v490_v2  ;;  %v495_v7 = vld [vmem:[%s660_s1 + $0x88] sm:$0xff]   ;;  %v499_v11 = vld [vmem:[%s660_s1 + $0x90] sm:$0xff]   ;;  %vm395_vm0 = vcmp.eq.s32.totalorder %v393_v62, 1  ;;  %vm394_vm1 = vcmp.eq.s32.totalorder %v393_v62, 0 }
   0x5   :  { %467 = vmatpush3.bf16.msra.mxu1 %v491_v3  ;;  %446 = vmatprep.subr.bf16.mxu0 %v492_v4  ;;  %v500_v12 = vld [vmem:[%s660_s1 + $0x58] sm:$0xff]   ;;  %v504_v16 = vld [vmem:[%s660_s1 + $0x60] sm:$0xff]   ;;  %v508_v20 = vld [vmem:[%s660_s1 + $0x68] sm:$0xff]  }
   0x6   :  { %468 = vmatprep.subr.bf16.mxu1 %v493_v5  ;;  %v501_v13 = vld [vmem:[%s660_s1 + $0xd8] sm:$0xff]   ;;  %v505_v17 = vld [vmem:[%s660_s1 + $0xe0] sm:$0xff]   ;;  %v509_v21 = vld [vmem:[%s660_s1 + $0xe8] sm:$0xff]  }
   0x7   :  { %v502_v14 = vld [vmem:[%s660_s1 + $0x18] sm:$0xff]   ;;  %v506_v18 = vld [vmem:[%s660_s1 + $0x20] sm:$0xff]   ;;  %v510_v22 = vld [vmem:[%s660_s1 + $0x28] sm:$0xff]  }
   0x8   :  { %447 = vmatpush3.bf16.msra.mxu0 %v494_v6  ;;  %v503_v15 = vld [vmem:[%s660_s1 + $0x98] sm:$0xff]   ;;  %v507_v19 = vld [vmem:[%s660_s1 + $0xa0] sm:$0xff]   ;;  %v511_v23 = vld [vmem:[%s660_s1 + $0xa8] sm:$0xff]  }
   0x9   :  { %469 = vmatpush3.bf16.msra.mxu1 %v495_v7  ;;  %448 = vmatprep.subr.bf16.mxu0 %v496_v8  ;;  %v512_v24 = vld [vmem:[%s660_s1 + $0x70] sm:$0xff]   ;;  %v516_v28 = vld [vmem:[%s660_s1 + $0x78] sm:$0xff]   ;;  %v17_v32 = vld [vmem:[%s661_s0] sm:$0xff] }
   0xa   :  { %470 = vmatprep.subr.bf16.mxu1 %v497_v9  ;;  %v513_v25 = vld [vmem:[%s660_s1 + $0xf0] sm:$0xff]   ;;  %v517_v29 = vld [vmem:[%s660_s1 + $0xf8] sm:$0xff]   ;;  %v18_v33 = vld [vmem:[%s661_s0 + $0x8] sm:$0xff]  ;;  %v408_v34 = vcombine.low %v17_v32, %v17_v32  ;;  %v409_v35 = vcombine.high %v17_v32, %v17_v32 }
   0xb   :  { %v514_v26 = vld [vmem:[%s660_s1 + $0x30] sm:$0xff]   ;;  %v518_v30 = vld [vmem:[%s660_s1 + $0x38] sm:$0xff]   ;;  %v410_v36 = vcombine.low %v18_v33, %v18_v33  ;;  %v411_v37 = vcombine.high %v18_v33, %v18_v33  ;;  %v407_v40 = vld [vmem:[%s662_s2] ss:$0 sm:$0xff] }
   0xc   :  { %449 = vmatpush3.bf16.msra.mxu0 %v498_v10  ;;  %v515_v27 = vld [vmem:[%s660_s1 + $0xb0] sm:$0xff]   ;;  %v519_v31 = vld [vmem:[%s660_s1 + $0xb8] sm:$0xff]   ;;  %328 = vmatprep.mubr.bf16.mxu0 %v409_v35 }
   0xd   :  { %471 = vmatpush3.bf16.msra.mxu1 %v499_v11  ;;  %450 = vmatprep.subr.bf16.mxu0 %v500_v12 }
   0xe   :  { %472 = vmatprep.subr.bf16.mxu1 %v501_v13  ;;  %368 = vmatprep.mubr.bf16.mxu1 %v411_v37 }
  0x10   :  { %451 = vmatpush3.bf16.msra.mxu0 %v502_v14 }
  0x11   :  { %473 = vmatpush3.bf16.msra.mxu1 %v503_v15  ;;  %452 = vmatprep.subr.bf16.mxu0 %v504_v16 }
  0x12   :  { %474 = vmatprep.subr.bf16.mxu1 %v505_v17 }
  0x14   :  { %453 = vmatpush3.bf16.msra.mxu0 %v506_v18 }
  0x15   :  { %475 = vmatpush3.bf16.msra.mxu1 %v507_v19  ;;  %454 = vmatprep.subr.bf16.mxu0 %v508_v20 }
  0x16   :  { %476 = vmatprep.subr.bf16.mxu1 %v509_v21 }
  0x18   :  { %455 = vmatpush3.bf16.msra.mxu0 %v510_v22 }
  0x19   :  { %477 = vmatpush3.bf16.msra.mxu1 %v511_v23  ;;  %456 = vmatprep.subr.bf16.mxu0 %v512_v24 }
  0x1a   :  { %478 = vmatprep.subr.bf16.mxu1 %v513_v25 }
  0x1c   :  { %457 = vmatpush3.bf16.msra.mxu0 %v514_v26 }
  0x1d   :  { %479 = vmatpush3.bf16.msra.mxu1 %v515_v27  ;;  %458 = vmatprep.subr.bf16.mxu0 %v516_v28 }
  0x1e   :  { %480 = vmatprep.subr.bf16.mxu1 %v517_v29 }
  0x20   :  { %459 = vmatpush3.bf16.msra.mxu0 %v518_v30 }
  0x21   :  { %481 = vmatpush3.bf16.msra.mxu1 %v519_v31 }
  0x23   :  { %329 = vmatmul.mubr.bf16.vlgmr.msra.gmra.mrb[0].mxu0 %v408_v34 }
  0x24   :  { %369 = vmatmul.mubr.bf16.vlgmr.msra.gmra.mrb[0].mxu1 %v410_v36 }
  0xf6   :  { %v460_v38 = vpop.f32.mrb[0].mxu0 }
  0xf7   :  { %v482_v39 = vpop.f32.mrb[0].mxu1  ;;  %v461_v41 = vpop.f32.mrb[1].mxu0 }
  0xf8   :  { %v483_v42 = vpop.f32.mrb[1].mxu1  ;;  %v462_v43 = vadd.f32 %v461_v41, %v460_v38  ;;  %v463_v45 = vpop.f32.mrb[2].mxu0 }
  0xf9   :  { %v484_v44 = vadd.f32 %v483_v42, %v482_v39  ;;  %v485_v46 = vpop.f32.mrb[2].mxu1  ;;  %v464_v47 = vpop.f32.mrb[3].mxu0 }
  0xfa   :  { %v486_v48 = vpop.f32.mrb[3].mxu1  ;;  %v331_v49 = vadd.f32 %v462_v43, %v407_v40 }
  0xfc   :  { %v371_v50 = vadd.f32 %v484_v44, %v331_v49 }
  0xfe   :  { %v376_v51 = vpack.c.bf16 %v371_v50, %v371_v50  ;;  %v378_v52 = vsub.f32 %v371_v50, %v407_v40 }
 0x100   :  { %377 = vst [vmem:[%s663_s3] sm:$0xf] %v376_v51  ;;  %v379_v53 = vrot.slane %v378_v52, 4  ;;  %v385_v54 = vmul.f32 %v378_v52, %v378_v52 }
 0x102   :  { %v380_v55 = vadd.f32 %v379_v53, %v378_v52  ;;  %v386_v56 = vrot.slane %v385_v54, 4 }
 0x104   :  { %v381_v58 = vrot.slane %v380_v55, 2  ;;  %v387_v59 = vadd.f32 %v386_v56, %v385_v54 }
 0x106   :  { %v382_v60 = vadd.f32 %v381_v58, %v380_v55  ;;  %v388_v61 = vrot.slane %v387_v59, 2 }
 0x108   :  { %v389_v63 = vadd.f32 %v388_v61, %v387_v59  ;;  %v383_v0 = vrot.slane %v382_v60, 1 }
 0x10a   :  { %v390_v1 = vrot.slane %v389_v63, 1  ;;  %v384_v3 = vadd.f32 %v383_v0, %v382_v60 }
 0x10c   :  { %v391_v2 = vadd.f32 %v390_v1, %v389_v63 }
 0x10e   :  { %v396_v4 = vsel %vm395_vm0, %v391_v2, 0.0 }
 0x10f   :  { %v397_v5 = vsel %vm394_vm1, %v384_v3, %v396_v4 }
 0x110   :  { %398 = vst [vmem:[%s664_s4] sm:$0xff] %v397_v5 }

// kernel: turbnet_d_forward.9
= control target key start
LH: loop header
LB: loop body
LE: loop exit
PB: predicated region body
PF: predicated region fallthrough
CT: control target
= control target key end

     0   :  { %s1204_s1 = inlined_call_operand.vmem [shape: bf16[1024,128], index: 1, kind: input, shape index: {}]   ;;  %s1205_s0 = inlined_call_operand.vmem [shape: bf16[8,1024], index: 0, kind: input, shape index: {}]   ;;  %s1206_s2 = inlined_call_operand.vmem [shape: f32[1,128], index: 2, kind: input, shape index: {}]   ;;  %s1207_s3 = inlined_call_operand.vmem [shape: f32[8,128], index: 3, kind: output, shape index: {}]  }
   0x1   :  { %v898_v0 = vld [vmem:[%s1204_s1 + $0x40] sm:$0xff]   ;;  %v902_v4 = vld [vmem:[%s1204_s1 + $0x48] sm:$0xff]   ;;  %v906_v8 = vld [vmem:[%s1204_s1 + $0x50] sm:$0xff]  }
   0x2   :  { %v899_v1 = vld [vmem:[%s1204_s1 + $0xc0] sm:$0xff]   ;;  %810 = vmatprep.subr.bf16.mxu0 %v898_v0  ;;  %v903_v5 = vld [vmem:[%s1204_s1 + $0xc8] sm:$0xff]   ;;  %v907_v9 = vld [vmem:[%s1204_s1 + $0xd0] sm:$0xff]  }
   0x3   :  { %v900_v2 = vld [vmem:[%s1204_s1] sm:$0xff]   ;;  %832 = vmatprep.subr.bf16.mxu1 %v899_v1  ;;  %v904_v6 = vld [vmem:[%s1204_s1 + $0x8] sm:$0xff]   ;;  %v908_v10 = vld [vmem:[%s1204_s1 + $0x10] sm:$0xff]  }
   0x4   :  { %v901_v3 = vld [vmem:[%s1204_s1 + $0x80] sm:$0xff]   ;;  %811 = vmatpush3.bf16.msra.mxu0 %v900_v2  ;;  %v905_v7 = vld [vmem:[%s1204_s1 + $0x88] sm:$0xff]   ;;  %v909_v11 = vld [vmem:[%s1204_s1 + $0x90] sm:$0xff]  }
   0x5   :  { %833 = vmatpush3.bf16.msra.mxu1 %v901_v3  ;;  %812 = vmatprep.subr.bf16.mxu0 %v902_v4  ;;  %v910_v12 = vld [vmem:[%s1204_s1 + $0x58] sm:$0xff]   ;;  %v914_v16 = vld [vmem:[%s1204_s1 + $0x60] sm:$0xff]   ;;  %v918_v20 = vld [vmem:[%s1204_s1 + $0x68] sm:$0xff]  }
   0x6   :  { %834 = vmatprep.subr.bf16.mxu1 %v903_v5  ;;  %v911_v13 = vld [vmem:[%s1204_s1 + $0xd8] sm:$0xff]   ;;  %v915_v17 = vld [vmem:[%s1204_s1 + $0xe0] sm:$0xff]   ;;  %v919_v21 = vld [vmem:[%s1204_s1 + $0xe8] sm:$0xff]  }
   0x7   :  { %v912_v14 = vld [vmem:[%s1204_s1 + $0x18] sm:$0xff]   ;;  %v916_v18 = vld [vmem:[%s1204_s1 + $0x20] sm:$0xff]   ;;  %v920_v22 = vld [vmem:[%s1204_s1 + $0x28] sm:$0xff]  }
   0x8   :  { %813 = vmatpush3.bf16.msra.mxu0 %v904_v6  ;;  %v913_v15 = vld [vmem:[%s1204_s1 + $0x98] sm:$0xff]   ;;  %v917_v19 = vld [vmem:[%s1204_s1 + $0xa0] sm:$0xff]   ;;  %v921_v23 = vld [vmem:[%s1204_s1 + $0xa8] sm:$0xff]  }
   0x9   :  { %835 = vmatpush3.bf16.msra.mxu1 %v905_v7  ;;  %814 = vmatprep.subr.bf16.mxu0 %v906_v8  ;;  %v922_v24 = vld [vmem:[%s1204_s1 + $0x70] sm:$0xff]   ;;  %v926_v28 = vld [vmem:[%s1204_s1 + $0x78] sm:$0xff]   ;;  %v15_v32 = vld [vmem:[%s1205_s0] sm:$0xff] }
   0xa   :  { %836 = vmatprep.subr.bf16.mxu1 %v907_v9  ;;  %v923_v25 = vld [vmem:[%s1204_s1 + $0xf0] sm:$0xff]   ;;  %v927_v29 = vld [vmem:[%s1204_s1 + $0xf8] sm:$0xff]   ;;  %v16_v33 = vld [vmem:[%s1205_s0 + $0x8] sm:$0xff]  ;;  %v738_v34 = vcombine.low %v15_v32, %v15_v32  ;;  %v739_v35 = vcombine.high %v15_v32, %v15_v32 }
   0xb   :  { %v924_v26 = vld [vmem:[%s1204_s1 + $0x30] sm:$0xff]   ;;  %v928_v30 = vld [vmem:[%s1204_s1 + $0x38] sm:$0xff]   ;;  %v740_v36 = vcombine.low %v16_v33, %v16_v33  ;;  %v741_v37 = vcombine.high %v16_v33, %v16_v33  ;;  %v934_v38 = vld [vmem:[%s1204_s1 + $0x140] sm:$0xff]  }
   0xc   :  { %815 = vmatpush3.bf16.msra.mxu0 %v908_v10  ;;  %v925_v27 = vld [vmem:[%s1204_s1 + $0xb0] sm:$0xff]   ;;  %v929_v31 = vld [vmem:[%s1204_s1 + $0xb8] sm:$0xff]   ;;  %v935_v39 = vld [vmem:[%s1204_s1 + $0x1c0] sm:$0xff]   ;;  %598 = vmatprep.mubr.bf16.mxu0 %v739_v35 }
   0xd   :  { %837 = vmatpush3.bf16.msra.mxu1 %v909_v11  ;;  %816 = vmatprep.subr.bf16.mxu0 %v910_v12  ;;  %v936_v40 = vld [vmem:[%s1204_s1 + $0x100] sm:$0xff]   ;;  %v938_v42 = vld [vmem:[%s1204_s1 + $0x148] sm:$0xff]   ;;  %v942_v46 = vld [vmem:[%s1204_s1 + $0x150] sm:$0xff]  }
   0xe   :  { %838 = vmatprep.subr.bf16.mxu1 %v911_v13  ;;  %638 = vmatprep.mubr.bf16.mxu1 %v741_v37  ;;  %v937_v41 = vld [vmem:[%s1204_s1 + $0x180] sm:$0xff]   ;;  %v939_v43 = vld [vmem:[%s1204_s1 + $0x1c8] sm:$0xff]   ;;  %v943_v47 = vld [vmem:[%s1204_s1 + $0x1d0] sm:$0xff]  }
   0xf   :  { %v940_v44 = vld [vmem:[%s1204_s1 + $0x108] sm:$0xff]   ;;  %v944_v48 = vld [vmem:[%s1204_s1 + $0x110] sm:$0xff]   ;;  %v946_v50 = vld [vmem:[%s1204_s1 + $0x158] sm:$0xff]  }
  0x10   :  { %817 = vmatpush3.bf16.msra.mxu0 %v912_v14  ;;  %v941_v45 = vld [vmem:[%s1204_s1 + $0x188] sm:$0xff]   ;;  %v945_v49 = vld [vmem:[%s1204_s1 + $0x190] sm:$0xff]   ;;  %v947_v51 = vld [vmem:[%s1204_s1 + $0x1d8] sm:$0xff]  }
  0x11   :  { %839 = vmatpush3.bf16.msra.mxu1 %v913_v15  ;;  %818 = vmatprep.subr.bf16.mxu0 %v914_v16  ;;  %v948_v52 = vld [vmem:[%s1204_s1 + $0x118] sm:$0xff]   ;;  %v950_v54 = vld [vmem:[%s1204_s1 + $0x160] sm:$0xff]   ;;  %v954_v58 = vld [vmem:[%s1204_s1 + $0x168] sm:$0xff]  }
  0x12   :  { %840 = vmatprep.subr.bf16.mxu1 %v915_v17  ;;  %v949_v53 = vld [vmem:[%s1204_s1 + $0x198] sm:$0xff]   ;;  %v951_v55 = vld [vmem:[%s1204_s1 + $0x1e0] sm:$0xff]   ;;  %v955_v59 = vld [vmem:[%s1204_s1 + $0x1e8] sm:$0xff]  }
  0x13   :  { %v952_v56 = vld [vmem:[%s1204_s1 + $0x120] sm:$0xff]   ;;  %v956_v60 = vld [vmem:[%s1204_s1 + $0x128] sm:$0xff]   ;;  %v958_v62 = vld [vmem:[%s1204_s1 + $0x170] sm:$0xff]  }
  0x14   :  { %819 = vmatpush3.bf16.msra.mxu0 %v916_v18  ;;  %v953_v57 = vld [vmem:[%s1204_s1 + $0x1a0] sm:$0xff]   ;;  %v957_v61 = vld [vmem:[%s1204_s1 + $0x1a8] sm:$0xff]   ;;  %v959_v63 = vld [vmem:[%s1204_s1 + $0x1f0] sm:$0xff]  }
  0x15   :  { %841 = vmatpush3.bf16.msra.mxu1 %v917_v19  ;;  %820 = vmatprep.subr.bf16.mxu0 %v918_v20  ;;  %v960_v0 = vld [vmem:[%s1204_s1 + $0x130] sm:$0xff]   ;;  %v962_v2 = vld [vmem:[%s1204_s1 + $0x178] sm:$0xff]   ;;  %v737_v14 = vld [vmem:[%s1206_s2] ss:$0 sm:$0xff] }
  0x16   :  { %842 = vmatprep.subr.bf16.mxu1 %v919_v21  ;;  %v961_v1 = vld [vmem:[%s1204_s1 + $0x1b0] sm:$0xff]   ;;  %v963_v3 = vld [vmem:[%s1204_s1 + $0x1f8] sm:$0xff]  }
  0x17   :  { %v964_v4 = vld [vmem:[%s1204_s1 + $0x138] sm:$0xff]   ;;  %v17_v6 = vld [vmem:[%s1205_s0 + $0x10] sm:$0xff] }
  0x18   :  { %821 = vmatpush3.bf16.msra.mxu0 %v920_v22  ;;  %v965_v5 = vld [vmem:[%s1204_s1 + $0x1b8] sm:$0xff]   ;;  %v742_v7 = vcombine.low %v17_v6, %v17_v6  ;;  %v743_v8 = vcombine.high %v17_v6, %v17_v6 }
  0x19   :  { %843 = vmatpush3.bf16.msra.mxu1 %v921_v23  ;;  %822 = vmatprep.subr.bf16.mxu0 %v922_v24  ;;  %v18_v9 = vld [vmem:[%s1205_s0 + $0x18] sm:$0xff] }
  0x1a   :  { %844 = vmatprep.subr.bf16.mxu1 %v923_v25  ;;  %v744_v10 = vcombine.low %v18_v9, %v18_v9  ;;  %v745_v11 = vcombine.high %v18_v9, %v18_v9 }
  0x1c   :  { %823 = vmatpush3.bf16.msra.mxu0 %v924_v26 }
  0x1d   :  { %845 = vmatpush3.bf16.msra.mxu1 %v925_v27  ;;  %824 = vmatprep.subr.bf16.mxu0 %v926_v28 }
  0x1e   :  { %846 = vmatprep.subr.bf16.mxu1 %v927_v29 }
  0x20   :  { %825 = vmatpush3.bf16.msra.mxu0 %v928_v30 }
  0x21   :  { %847 = vmatpush3.bf16.msra.mxu1 %v929_v31  ;;  %854 = vmatprep.subr.bf16.mxu0 %v934_v38 }
  0x22   :  { %876 = vmatprep.subr.bf16.mxu1 %v935_v39 }
  0x23   :  { %599 = vmatmul.mubr.bf16.vlgmr.msra.gmra.mrb[0].mxu0 %v738_v34 }
  0x24   :  { %639 = vmatmul.mubr.bf16.vlgmr.msra.gmra.mrb[0].mxu1 %v740_v36  ;;  %855 = vmatpush3.bf16.msra.mxu0 %v936_v40 }
  0x25   :  { %877 = vmatpush3.bf16.msra.mxu1 %v937_v41  ;;  %856 = vmatprep.subr.bf16.mxu0 %v938_v42 }
  0x26   :  { %878 = vmatprep.subr.bf16.mxu1 %v939_v43  ;;  %678 = vmatprep.mubr.bf16.mxu0 %v743_v8 }
  0x27   :  { %718 = vmatprep.mubr.bf16.mxu1 %v745_v11 }
  0x28   :  { %857 = vmatpush3.bf16.msra.mxu0 %v940_v44 }
  0x29   :  { %879 = vmatpush3.bf16.msra.mxu1 %v941_v45  ;;  %858 = vmatprep.subr.bf16.mxu0 %v942_v46 }
  0x2a   :  { %880 = vmatprep.subr.bf16.mxu1 %v943_v47 }
  0x2c   :  { %859 = vmatpush3.bf16.msra.mxu0 %v944_v48 }
  0x2d   :  { %881 = vmatpush3.bf16.msra.mxu1 %v945_v49  ;;  %860 = vmatprep.subr.bf16.mxu0 %v946_v50 }
  0x2e   :  { %882 = vmatprep.subr.bf16.mxu1 %v947_v51 }
  0x30   :  { %861 = vmatpush3.bf16.msra.mxu0 %v948_v52 }
  0x31   :  { %883 = vmatpush3.bf16.msra.mxu1 %v949_v53  ;;  %862 = vmatprep.subr.bf16.mxu0 %v950_v54 }
  0x32   :  { %884 = vmatprep.subr.bf16.mxu1 %v951_v55 }
  0x34   :  { %863 = vmatpush3.bf16.msra.mxu0 %v952_v56 }
  0x35   :  { %885 = vmatpush3.bf16.msra.mxu1 %v953_v57  ;;  %864 = vmatprep.subr.bf16.mxu0 %v954_v58 }
  0x36   :  { %886 = vmatprep.subr.bf16.mxu1 %v955_v59 }
  0x38   :  { %865 = vmatpush3.bf16.msra.mxu0 %v956_v60 }
  0x39   :  { %887 = vmatpush3.bf16.msra.mxu1 %v957_v61  ;;  %866 = vmatprep.subr.bf16.mxu0 %v958_v62 }
  0x3a   :  { %888 = vmatprep.subr.bf16.mxu1 %v959_v63 }
  0x3c   :  { %867 = vmatpush3.bf16.msra.mxu0 %v960_v0 }
  0x3d   :  { %889 = vmatpush3.bf16.msra.mxu1 %v961_v1  ;;  %868 = vmatprep.subr.bf16.mxu0 %v962_v2 }
  0x3e   :  { %890 = vmatprep.subr.bf16.mxu1 %v963_v3 }
  0x40   :  { %869 = vmatpush3.bf16.msra.mxu0 %v964_v4 }
  0x41   :  { %891 = vmatpush3.bf16.msra.mxu1 %v965_v5 }
  0x43   :  { %679 = vmatmul.mubr.bf16.vlgmr.msra.gmra.mrb[4].mxu0 %v742_v7 }
  0x44   :  { %719 = vmatmul.mubr.bf16.vlgmr.msra.gmra.mrb[4].mxu1 %v744_v10 }
  0xf6   :  { %v826_v12 = vpop.f32.mrb[0].mxu0 }
  0xf7   :  { %v848_v13 = vpop.f32.mrb[0].mxu1  ;;  %v827_v15 = vpop.f32.mrb[1].mxu0 }
  0xf8   :  { %v849_v16 = vpop.f32.mrb[1].mxu1  ;;  %v828_v17 = vadd.f32 %v827_v15, %v826_v12  ;;  %v829_v19 = vpop.f32.mrb[2].mxu0 }
  0xf9   :  { %v850_v18 = vadd.f32 %v849_v16, %v848_v13  ;;  %v851_v20 = vpop.f32.mrb[2].mxu1  ;;  %v830_v21 = vpop.f32.mrb[3].mxu0 }
  0xfa   :  { %v852_v22 = vpop.f32.mrb[3].mxu1  ;;  %v601_v23 = vadd.f32 %v828_v17, %v737_v14 }
  0xfc   :  { %v641_v24 = vadd.f32 %v850_v18, %v601_v23 }
 0x116   :  { %v870_v25 = vpop.f32.mrb[4].mxu0 }
 0x117   :  { %v892_v26 = vpop.f32.mrb[4].mxu1  ;;  %v871_v27 = vpop.f32.mrb[5].mxu0 }
 0x118   :  { %v893_v28 = vpop.f32.mrb[5].mxu1  ;;  %v872_v29 = vadd.f32 %v871_v27, %v870_v25  ;;  %v873_v31 = vpop.f32.mrb[6].mxu0 }
 0x119   :  { %v894_v30 = vadd.f32 %v893_v28, %v892_v26  ;;  %v895_v32 = vpop.f32.mrb[6].mxu1  ;;  %v874_v33 = vpop.f32.mrb[7].mxu0 }
 0x11a   :  { %v896_v34 = vpop.f32.mrb[7].mxu1  ;;  %v681_v35 = vadd.f32 %v872_v29, %v641_v24 }
 0x11c   :  { %v721_v36 = vadd.f32 %v894_v30, %v681_v35 }
 0x11e   :  { %v726_v37 = vsub.f32 0.0, %v721_v36 }
 0x120   :  { %v727_v38 = vmul.f32 1.442695, %v726_v37 }
 0x122   :  { %970 = vpow2.f32 %v727_v38 }
 0x12c   :  { %v971_v39 = vpop.eup %970 }
 0x12d   :  { %v729_v40 = vadd.f32 1.0, %v971_v39 }
 0x12f   :  { %972 = vrcp.f32 %v729_v40 }
 0x139   :  { %v973_v41 = vpop.eup %972 }
 0x13a   :  { %732 = vst [vmem:[%s1207_s3] sm:$0xff] %v973_v41 }

</bundles_post_ra>
